<compile_context>
chip_gen: v7x
topology: tpu7x:2x2x1
jax: 0.10.0
libtpu: 0.0.40
codegen_flags: <defaults>
</compile_context>

<pallas_src>
import functools

import jax
import jax.numpy as jnp
from jax import lax
from jax.experimental import pallas as pl
from jax.experimental.pallas import tpu as pltpu


def textrcnn_kernel(embed_ref,                      # [T, TB, E]
                    wih_f_ref, whh_f_ref, b_f_ref,  # [E,4H], [H,4H], [1,4H]
                    wih_b_ref, whh_b_ref, b_b_ref,  # same, reverse direction
                    fc_w_ref, fc_b_ref,             # [E+2H, Op], [1, Op]
                    out_ref,                        # [TB, Op]
                    gx_f_ref, gx_b_ref,             # scratch [T, TB, 4H]
                    *, unroll):
    T, TB, E = embed_ref.shape
    H4 = whh_f_ref.shape[1]
    H = H4 // 4

    # ---- Hoisted input projection (one big MXU matmul per direction), bias
    # folded in so the recurrent loop never re-broadcasts it. ----
    x2d = embed_ref[...].reshape(T * TB, E)
    gx_f_ref[...] = (jnp.dot(x2d, wih_f_ref[...],
                             preferred_element_type=jnp.float32)
                     + b_f_ref[...]).reshape(T, TB, H4)
    gx_b_ref[...] = (jnp.dot(x2d, wih_b_ref[...],
                             preferred_element_type=jnp.float32)
                     + b_b_ref[...]).reshape(T, TB, H4)

    whh_f = whh_f_ref[...]
    whh_b = whh_b_ref[...]

    def cell(gx, h, c, whh):
        # gx already holds x @ Wih + (b_ih + b_hh); add the recurrent term.
        g = gx + jnp.dot(h, whh, preferred_element_type=jnp.float32)
        i = jax.nn.sigmoid(g[:, 0 * H:1 * H])
        f = jax.nn.sigmoid(g[:, 1 * H:2 * H])
        gg = jnp.tanh(g[:, 2 * H:3 * H])
        o = jax.nn.sigmoid(g[:, 3 * H:4 * H])
        c_new = f * c + i * gg
        h_new = o * jnp.tanh(c_new)
        return h_new, c_new

    zeros = jnp.zeros((TB, H), jnp.float32)
    ninf = jnp.full((TB, H), -jnp.inf, jnp.float32)

    # ---- Single loop interleaving the two independent direction chains, with
    # running-max accumulators instead of [T, B, H] buffers. ----
    def body(t, carry):
        h_f, c_f, h_b, c_b, m_f, m_b = carry
        h_f, c_f = cell(gx_f_ref[t], h_f, c_f, whh_f)
        h_b, c_b = cell(gx_b_ref[T - 1 - t], h_b, c_b, whh_b)
        return (h_f, c_f, h_b, c_b,
                jnp.maximum(m_f, h_f), jnp.maximum(m_b, h_b))

    _, _, _, _, m_f, m_b = lax.fori_loop(
        0, T, body, (zeros, zeros, zeros, zeros, ninf, ninf), unroll=unroll)

    # relu(cat(embed, h_fwd, h_bwd)) max-pooled over time == relu of per-segment
    # max over time (relu monotone, concat commutes with the feature-wise max).
    m_e = jnp.max(embed_ref[...], axis=0)                       # [TB, E]
    pooled = jnp.maximum(jnp.concatenate([m_e, m_f, m_b], axis=-1), 0.0)

    # Fused, lane-dense (O padded to 128) final Linear.
    out_ref[...] = (jnp.dot(pooled, fc_w_ref[...],
                            preferred_element_type=jnp.float32)
                    + fc_b_ref[...])


def textrcnn_forward(inputs, params):
    # TODO(synk): embedding gather kept as jnp.take in the wrapper; for large
    # vocab/E it could be moved in-kernel via scalar-prefetched ids + DMA.
    emb = jnp.take(params["embedding"], inputs, axis=0)            # [B, T, E]
    B, T, E = emb.shape
    H = params["whh_f"].shape[0]
    O = params["fc_b"].shape[-1]

    TB = 8                                    # batch tile (f32 sublane = 8)
    B_pad = ((B + TB - 1) // TB) * TB
    O_pad = ((O + 127) // 128) * 128          # lane-dense output

    embed_tm = jnp.transpose(emb, (1, 0, 2)).astype(jnp.float32)   # [T, B, E]
    if B_pad != B:
        embed_tm = jnp.pad(embed_tm, ((0, 0), (0, B_pad - B), (0, 0)))

    # Fused fc weight [E+2H, O_pad]: rows ordered as [embed | h_fwd | h_bwd].
    fc_w = jnp.concatenate(
        [params["fc_we"], params["fc_wf"], params["fc_wb"]], axis=0)
    fc_w = jnp.pad(fc_w, ((0, 0), (0, O_pad - O)))
    fc_b = jnp.pad(params["fc_b"], ((0, 0), (0, O_pad - O)))

    unroll = T if T <= 8 else 8
    kernel = functools.partial(textrcnn_kernel, unroll=unroll)

    def full(shape):
        return pl.BlockSpec(shape, lambda b: (0,) * len(shape))

    out = pl.pallas_call(
        kernel,
        out_shape=jax.ShapeDtypeStruct((B_pad, O_pad), jnp.float32),
        grid_spec=pltpu.PrefetchScalarGridSpec(
            num_scalar_prefetch=0,
            grid=(B_pad // TB,),
            in_specs=[
                pl.BlockSpec((T, TB, E), lambda b: (0, b, 0)),
                full((E, 4 * H)), full((H, 4 * H)), full((1, 4 * H)),
                full((E, 4 * H)), full((H, 4 * H)), full((1, 4 * H)),
                full((E + 2 * H, O_pad)), full((1, O_pad)),
            ],
            out_specs=pl.BlockSpec((TB, O_pad), lambda b: (b, 0)),
            scratch_shapes=[pltpu.VMEM((T, TB, 4 * H), jnp.float32),
                            pltpu.VMEM((T, TB, 4 * H), jnp.float32)],
        ),
        compiler_params=pltpu.CompilerParams(
            dimension_semantics=("parallel",),
            vmem_limit_bytes=64 * 1024 * 1024),
    )(embed_tm,
      params["wih_f"], params["whh_f"], params["b_f"],
      params["wih_b"], params["whh_b"], params["b_b"],
      fc_w, fc_b)

    return out[:B, :O]


def textrcnn_reference(inputs, params):
    # Pure-JAX reference mirroring the PyTorch forward (fused-gate layout).
    emb = jnp.take(params["embedding"], inputs, axis=0)  # [B, T, E]
    B = emb.shape[0]
    H = params["whh_f"].shape[0]
    x_tm = jnp.transpose(emb, (1, 0, 2)).astype(jnp.float32)  # [T, B, E]

    def run(xs, wih, whh, b):
        def step(carry, x):
            h, c = carry
            g = x @ wih + h @ whh + b
            i = jax.nn.sigmoid(g[:, 0 * H:1 * H])
            f = jax.nn.sigmoid(g[:, 1 * H:2 * H])
            gg = jnp.tanh(g[:, 2 * H:3 * H])
            o = jax.nn.sigmoid(g[:, 3 * H:4 * H])
            c = f * c + i * gg
            h = o * jnp.tanh(c)
            return (h, c), h
        h0 = jnp.zeros((B, H), jnp.float32)
        _, hs = lax.scan(step, (h0, h0), xs)
        return hs  # [T, B, H]

    hf = run(x_tm, params["wih_f"], params["whh_f"], params["b_f"])
    hb = run(x_tm[::-1], params["wih_b"], params["whh_b"], params["b_b"])[::-1]
    cat = jnp.concatenate([x_tm, hf, hb], axis=-1)
    pooled = jnp.max(jax.nn.relu(cat), axis=0)           # [B, E + 2H]
    W = jnp.concatenate([params["fc_we"], params["fc_wf"], params["fc_wb"]],
                        axis=0)
    return pooled @ W + params["fc_b"]


if __name__ == "__main__":
    V, E, H, O, T, B = 50, 16, 16, 5, 8, 2  # vocab, embed, hiddens, classes, seq, batch
    key = jax.random.PRNGKey(0)
    ks = jax.random.split(key, 12)
    s = 0.1
    params = {
        "embedding": jax.random.normal(ks[0], (V, E), jnp.float32) * s,
        # Fused gate layout: [in, 4H] / [H, 4H] / [1, 4H] with gates (i|f|g|o);
        # bias is the sum of PyTorch's bias_ih + bias_hh.
        "wih_f": jax.random.normal(ks[1], (E, 4 * H), jnp.float32) * s,
        "whh_f": jax.random.normal(ks[2], (H, 4 * H), jnp.float32) * s,
        "b_f":   jax.random.normal(ks[3], (1, 4 * H), jnp.float32) * s,
        "wih_b": jax.random.normal(ks[4], (E, 4 * H), jnp.float32) * s,
        "whh_b": jax.random.normal(ks[5], (H, 4 * H), jnp.float32) * s,
        "b_b":   jax.random.normal(ks[6], (1, 4 * H), jnp.float32) * s,
        "fc_we": jax.random.normal(ks[7], (E, O), jnp.float32) * s,
        "fc_wf": jax.random.normal(ks[8], (H, O), jnp.float32) * s,
        "fc_wb": jax.random.normal(ks[9], (H, O), jnp.float32) * s,
        "fc_b":  jax.random.normal(ks[10], (1, O), jnp.float32) * s,
    }
    inputs = jax.random.randint(ks[11], (B, T), 0, V, dtype=jnp.int32)

    out = jax.block_until_ready(textrcnn_forward(inputs, params))
    assert out.shape == (B, O), out.shape
    assert bool(jnp.all(jnp.isfinite(out)))

    with jax.default_matmul_precision("float32"):
        ref = jax.block_until_ready(textrcnn_reference(inputs, params))
    assert bool(jnp.allclose(out, ref, rtol=2e-3, atol=2e-3)), (out, ref)

    print("KERNEL_OK")
</pallas_src>

<mosaic_0001>
module attributes {stable_mosaic.version = 11 : i64} {
  func.func @textrcnn_kernel(%arg0: i32, %arg1: memref<8x8x16xf32, #tpu.memory_space<vmem>>, %arg2: memref<16x64xf32, #tpu.memory_space<vmem>>, %arg3: memref<16x64xf32, #tpu.memory_space<vmem>>, %arg4: memref<1x64xf32, #tpu.memory_space<vmem>>, %arg5: memref<16x64xf32, #tpu.memory_space<vmem>>, %arg6: memref<16x64xf32, #tpu.memory_space<vmem>>, %arg7: memref<1x64xf32, #tpu.memory_space<vmem>>, %arg8: memref<48x128xf32, #tpu.memory_space<vmem>>, %arg9: memref<1x128xf32, #tpu.memory_space<vmem>>, %arg10: memref<8x128xf32, #tpu.memory_space<vmem>>, %arg11: memref<8x8x64xf32, #tpu.memory_space<vmem>>, %arg12: memref<8x8x64xf32, #tpu.memory_space<vmem>>) attributes {dimension_semantics = [#tpu.dimension_semantics<parallel>], iteration_bounds = array<i64: 1>, scalar_prefetch = 0 : i64, scratch_operands = 2 : i64, tpu.core_type = #tpu.core_type<tc>, window_params = [{transform_indices = @transform_0, window_bounds = array<i64: 8, 8, 16>}, {pipeline_mode = #tpu.pipeline_mode<synchronous>, transform_indices = @transform_1, window_bounds = array<i64: 16, 64>}, {pipeline_mode = #tpu.pipeline_mode<synchronous>, transform_indices = @transform_2, window_bounds = array<i64: 16, 64>}, {pipeline_mode = #tpu.pipeline_mode<synchronous>, transform_indices = @transform_3, window_bounds = array<i64: 1, 64>}, {pipeline_mode = #tpu.pipeline_mode<synchronous>, transform_indices = @transform_4, window_bounds = array<i64: 16, 64>}, {pipeline_mode = #tpu.pipeline_mode<synchronous>, transform_indices = @transform_5, window_bounds = array<i64: 16, 64>}, {pipeline_mode = #tpu.pipeline_mode<synchronous>, transform_indices = @transform_6, window_bounds = array<i64: 1, 64>}, {pipeline_mode = #tpu.pipeline_mode<synchronous>, transform_indices = @transform_7, window_bounds = array<i64: 48, 128>}, {pipeline_mode = #tpu.pipeline_mode<synchronous>, transform_indices = @transform_8, window_bounds = array<i64: 1, 128>}, {transform_indices = @transform_9, window_bounds = array<i64: 8, 128>}]} {
    %c0 = arith.constant 0 : index
    %c0_0 = arith.constant 0 : index
    %c0_1 = arith.constant 0 : index
    %0 = vector.load %arg1[%c0, %c0_0, %c0_1] : memref<8x8x16xf32, #tpu.memory_space<vmem>>, vector<8x8x16xf32>
    %1 = vector.shape_cast %0 : vector<8x8x16xf32> to vector<64x16xf32>
    %c0_2 = arith.constant 0 : index
    %c0_3 = arith.constant 0 : index
    %2 = vector.load %arg2[%c0_2, %c0_3] : memref<16x64xf32, #tpu.memory_space<vmem>>, vector<16x64xf32>
    %cst = arith.constant dense<0.000000e+00> : vector<64x64xf32>
    %3 = tpu.matmul %1, %2, %cst {dimension_numbers = #tpu.dot_dimension_numbers<[1], [0], [0], [1], [0, 0, 1, 1], [], []>} : vector<64x16xf32>, vector<16x64xf32>, vector<64x64xf32> -> vector<64x64xf32>
    %c0_4 = arith.constant 0 : index
    %c0_5 = arith.constant 0 : index
    %4 = vector.load %arg4[%c0_4, %c0_5] : memref<1x64xf32, #tpu.memory_space<vmem>>, vector<1x64xf32>
    %5 = vector.broadcast %4 : vector<1x64xf32> to vector<64x64xf32>
    %6 = arith.addf %3, %5 : vector<64x64xf32>
    %7 = vector.shape_cast %6 : vector<64x64xf32> to vector<8x8x64xf32>
    %c0_6 = arith.constant 0 : index
    %c0_7 = arith.constant 0 : index
    %c0_8 = arith.constant 0 : index
    %8 = vector.load %arg11[%c0_6, %c0_7, %c0_8] : memref<8x8x64xf32, #tpu.memory_space<vmem>>, vector<8x8x64xf32>
    tpu.vector_store %arg11[%c0_6, %c0_7, %c0_8], %7 {strides = array<i32>} : memref<8x8x64xf32, #tpu.memory_space<vmem>>, vector<8x8x64xf32>,
    %c0_9 = arith.constant 0 : index
    %c0_10 = arith.constant 0 : index
    %9 = vector.load %arg5[%c0_9, %c0_10] : memref<16x64xf32, #tpu.memory_space<vmem>>, vector<16x64xf32>
    %cst_11 = arith.constant dense<0.000000e+00> : vector<64x64xf32>
    %10 = tpu.matmul %1, %9, %cst_11 {dimension_numbers = #tpu.dot_dimension_numbers<[1], [0], [0], [1], [0, 0, 1, 1], [], []>} : vector<64x16xf32>, vector<16x64xf32>, vector<64x64xf32> -> vector<64x64xf32>
    %c0_12 = arith.constant 0 : index
    %c0_13 = arith.constant 0 : index
    %11 = vector.load %arg7[%c0_12, %c0_13] : memref<1x64xf32, #tpu.memory_space<vmem>>, vector<1x64xf32>
    %12 = vector.broadcast %11 : vector<1x64xf32> to vector<64x64xf32>
    %13 = arith.addf %10, %12 : vector<64x64xf32>
    %14 = vector.shape_cast %13 : vector<64x64xf32> to vector<8x8x64xf32>
    %c0_14 = arith.constant 0 : index
    %c0_15 = arith.constant 0 : index
    %c0_16 = arith.constant 0 : index
    %15 = vector.load %arg12[%c0_14, %c0_15, %c0_16] : memref<8x8x64xf32, #tpu.memory_space<vmem>>, vector<8x8x64xf32>
    tpu.vector_store %arg12[%c0_14, %c0_15, %c0_16], %14 {strides = array<i32>} : memref<8x8x64xf32, #tpu.memory_space<vmem>>, vector<8x8x64xf32>,
    %c0_17 = arith.constant 0 : index
    %c0_18 = arith.constant 0 : index
    %16 = vector.load %arg3[%c0_17, %c0_18] : memref<16x64xf32, #tpu.memory_space<vmem>>, vector<16x64xf32>
    %c0_19 = arith.constant 0 : index
    %c0_20 = arith.constant 0 : index
    %17 = vector.load %arg6[%c0_19, %c0_20] : memref<16x64xf32, #tpu.memory_space<vmem>>, vector<16x64xf32>
    %cst_21 = arith.constant 0.000000e+00 : f32
    %18 = vector.broadcast %cst_21 : f32 to vector<8x16xf32>
    %cst_22 = arith.constant 0xFF800000 : f32
    %19 = vector.broadcast %cst_22 : f32 to vector<8x16xf32>
    %c0_i32 = arith.constant 0 : i32
    %20 = arith.index_cast %c0_i32 : i32 to index
    %c0_23 = arith.constant 0 : index
    %c0_24 = arith.constant 0 : index
    %21 = vector.load %arg11[%20, %c0_23, %c0_24] : memref<8x8x64xf32, #tpu.memory_space<vmem>>, vector<1x8x64xf32>
    %22 = vector.shape_cast %21 : vector<1x8x64xf32> to vector<8x64xf32>
    %cst_25 = arith.constant dense<0.000000e+00> : vector<8x64xf32>
    %23 = tpu.matmul %18, %16, %cst_25 {dimension_numbers = #tpu.dot_dimension_numbers<[1], [0], [0], [1], [0, 0, 1, 1], [], []>} : vector<8x16xf32>, vector<16x64xf32>, vector<8x64xf32> -> vector<8x64xf32>
    %24 = arith.addf %22, %23 : vector<8x64xf32>
    %25 = vector.extract_strided_slice %24 {offsets = [0, 0], sizes = [8, 16], strides = [1, 1]} : vector<8x64xf32> to vector<8x16xf32>
    %26 = arith.negf %25 : vector<8x16xf32>
    %27 = math.exp %26 : vector<8x16xf32>
    %cst_26 = arith.constant 1.000000e+00 : f32
    %28 = vector.broadcast %cst_26 : f32 to vector<8x16xf32>
    %29 = arith.addf %28, %27 : vector<8x16xf32>
    %30 = arith.divf %28, %29 : vector<8x16xf32>
    %31 = vector.extract_strided_slice %24 {offsets = [0, 16], sizes = [8, 16], strides = [1, 1]} : vector<8x64xf32> to vector<8x16xf32>
    %32 = arith.negf %31 : vector<8x16xf32>
    %33 = math.exp %32 : vector<8x16xf32>
    %cst_27 = arith.constant 1.000000e+00 : f32
    %34 = vector.broadcast %cst_27 : f32 to vector<8x16xf32>
    %35 = arith.addf %34, %33 : vector<8x16xf32>
    %36 = arith.divf %34, %35 : vector<8x16xf32>
    %37 = vector.extract_strided_slice %24 {offsets = [0, 32], sizes = [8, 16], strides = [1, 1]} : vector<8x64xf32> to vector<8x16xf32>
    %38 = math.tanh %37 : vector<8x16xf32>
    %39 = vector.extract_strided_slice %24 {offsets = [0, 48], sizes = [8, 16], strides = [1, 1]} : vector<8x64xf32> to vector<8x16xf32>
    %40 = arith.negf %39 : vector<8x16xf32>
    %41 = math.exp %40 : vector<8x16xf32>
    %cst_28 = arith.constant 1.000000e+00 : f32
    %42 = vector.broadcast %cst_28 : f32 to vector<8x16xf32>
    %43 = arith.addf %42, %41 : vector<8x16xf32>
    %44 = arith.divf %42, %43 : vector<8x16xf32>
    %45 = arith.mulf %36, %18 : vector<8x16xf32>
    %46 = arith.mulf %30, %38 : vector<8x16xf32>
    %47 = arith.addf %45, %46 : vector<8x16xf32>
    %48 = math.tanh %47 : vector<8x16xf32>
    %49 = arith.mulf %44, %48 : vector<8x16xf32>
    %c7_i32 = arith.constant 7 : i32
    %50 = arith.subi %c7_i32, %c0_i32 : i32
    %51 = arith.index_cast %50 : i32 to index
    %c0_29 = arith.constant 0 : index
    %c0_30 = arith.constant 0 : index
    %52 = vector.load %arg12[%51, %c0_29, %c0_30] : memref<8x8x64xf32, #tpu.memory_space<vmem>>, vector<1x8x64xf32>
    %53 = vector.shape_cast %52 : vector<1x8x64xf32> to vector<8x64xf32>
    %cst_31 = arith.constant dense<0.000000e+00> : vector<8x64xf32>
    %54 = tpu.matmul %18, %17, %cst_31 {dimension_numbers = #tpu.dot_dimension_numbers<[1], [0], [0], [1], [0, 0, 1, 1], [], []>} : vector<8x16xf32>, vector<16x64xf32>, vector<8x64xf32> -> vector<8x64xf32>
    %55 = arith.addf %53, %54 : vector<8x64xf32>
    %56 = vector.extract_strided_slice %55 {offsets = [0, 0], sizes = [8, 16], strides = [1, 1]} : vector<8x64xf32> to vector<8x16xf32>
    %57 = arith.negf %56 : vector<8x16xf32>
    %58 = math.exp %57 : vector<8x16xf32>
    %cst_32 = arith.constant 1.000000e+00 : f32
    %59 = vector.broadcast %cst_32 : f32 to vector<8x16xf32>
    %60 = arith.addf %59, %58 : vector<8x16xf32>
    %61 = arith.divf %59, %60 : vector<8x16xf32>
    %62 = vector.extract_strided_slice %55 {offsets = [0, 16], sizes = [8, 16], strides = [1, 1]} : vector<8x64xf32> to vector<8x16xf32>
    %63 = arith.negf %62 : vector<8x16xf32>
    %64 = math.exp %63 : vector<8x16xf32>
    %cst_33 = arith.constant 1.000000e+00 : f32
    %65 = vector.broadcast %cst_33 : f32 to vector<8x16xf32>
    %66 = arith.addf %65, %64 : vector<8x16xf32>
    %67 = arith.divf %65, %66 : vector<8x16xf32>
    %68 = vector.extract_strided_slice %55 {offsets = [0, 32], sizes = [8, 16], strides = [1, 1]} : vector<8x64xf32> to vector<8x16xf32>
    %69 = math.tanh %68 : vector<8x16xf32>
    %70 = vector.extract_strided_slice %55 {offsets = [0, 48], sizes = [8, 16], strides = [1, 1]} : vector<8x64xf32> to vector<8x16xf32>
    %71 = arith.negf %70 : vector<8x16xf32>
    %72 = math.exp %71 : vector<8x16xf32>
    %cst_34 = arith.constant 1.000000e+00 : f32
    %73 = vector.broadcast %cst_34 : f32 to vector<8x16xf32>
    %74 = arith.addf %73, %72 : vector<8x16xf32>
    %75 = arith.divf %73, %74 : vector<8x16xf32>
    %76 = arith.mulf %67, %18 : vector<8x16xf32>
    %77 = arith.mulf %61, %69 : vector<8x16xf32>
    %78 = arith.addf %76, %77 : vector<8x16xf32>
    %79 = math.tanh %78 : vector<8x16xf32>
    %80 = arith.mulf %75, %79 : vector<8x16xf32>
    %81 = arith.maximumf %19, %49 : vector<8x16xf32>
    %82 = arith.maximumf %19, %80 : vector<8x16xf32>
    %c1_i32 = arith.constant 1 : i32
    %83 = arith.index_cast %c1_i32 : i32 to index
    %c0_35 = arith.constant 0 : index
    %c0_36 = arith.constant 0 : index
    %84 = vector.load %arg11[%83, %c0_35, %c0_36] : memref<8x8x64xf32, #tpu.memory_space<vmem>>, vector<1x8x64xf32>
    %85 = vector.shape_cast %84 : vector<1x8x64xf32> to vector<8x64xf32>
    %cst_37 = arith.constant dense<0.000000e+00> : vector<8x64xf32>
    %86 = tpu.matmul %49, %16, %cst_37 {dimension_numbers = #tpu.dot_dimension_numbers<[1], [0], [0], [1], [0, 0, 1, 1], [], []>} : vector<8x16xf32>, vector<16x64xf32>, vector<8x64xf32> -> vector<8x64xf32>
    %87 = arith.addf %85, %86 : vector<8x64xf32>
    %88 = vector.extract_strided_slice %87 {offsets = [0, 0], sizes = [8, 16], strides = [1, 1]} : vector<8x64xf32> to vector<8x16xf32>
    %89 = arith.negf %88 : vector<8x16xf32>
    %90 = math.exp %89 : vector<8x16xf32>
    %cst_38 = arith.constant 1.000000e+00 : f32
    %91 = vector.broadcast %cst_38 : f32 to vector<8x16xf32>
    %92 = arith.addf %91, %90 : vector<8x16xf32>
    %93 = arith.divf %91, %92 : vector<8x16xf32>
    %94 = vector.extract_strided_slice %87 {offsets = [0, 16], sizes = [8, 16], strides = [1, 1]} : vector<8x64xf32> to vector<8x16xf32>
    %95 = arith.negf %94 : vector<8x16xf32>
    %96 = math.exp %95 : vector<8x16xf32>
    %cst_39 = arith.constant 1.000000e+00 : f32
    %97 = vector.broadcast %cst_39 : f32 to vector<8x16xf32>
    %98 = arith.addf %97, %96 : vector<8x16xf32>
    %99 = arith.divf %97, %98 : vector<8x16xf32>
    %100 = vector.extract_strided_slice %87 {offsets = [0, 32], sizes = [8, 16], strides = [1, 1]} : vector<8x64xf32> to vector<8x16xf32>
    %101 = math.tanh %100 : vector<8x16xf32>
    %102 = vector.extract_strided_slice %87 {offsets = [0, 48], sizes = [8, 16], strides = [1, 1]} : vector<8x64xf32> to vector<8x16xf32>
    %103 = arith.negf %102 : vector<8x16xf32>
    %104 = math.exp %103 : vector<8x16xf32>
    %cst_40 = arith.constant 1.000000e+00 : f32
    %105 = vector.broadcast %cst_40 : f32 to vector<8x16xf32>
    %106 = arith.addf %105, %104 : vector<8x16xf32>
    %107 = arith.divf %105, %106 : vector<8x16xf32>
    %108 = arith.mulf %99, %47 : vector<8x16xf32>
    %109 = arith.mulf %93, %101 : vector<8x16xf32>
    %110 = arith.addf %108, %109 : vector<8x16xf32>
    %111 = math.tanh %110 : vector<8x16xf32>
    %112 = arith.mulf %107, %111 : vector<8x16xf32>
    %c7_i32_41 = arith.constant 7 : i32
    %113 = arith.subi %c7_i32_41, %c1_i32 : i32
    %114 = arith.index_cast %113 : i32 to index
    %c0_42 = arith.constant 0 : index
    %c0_43 = arith.constant 0 : index
    %115 = vector.load %arg12[%114, %c0_42, %c0_43] : memref<8x8x64xf32, #tpu.memory_space<vmem>>, vector<1x8x64xf32>
    %116 = vector.shape_cast %115 : vector<1x8x64xf32> to vector<8x64xf32>
    %cst_44 = arith.constant dense<0.000000e+00> : vector<8x64xf32>
    %117 = tpu.matmul %80, %17, %cst_44 {dimension_numbers = #tpu.dot_dimension_numbers<[1], [0], [0], [1], [0, 0, 1, 1], [], []>} : vector<8x16xf32>, vector<16x64xf32>, vector<8x64xf32> -> vector<8x64xf32>
    %118 = arith.addf %116, %117 : vector<8x64xf32>
    %119 = vector.extract_strided_slice %118 {offsets = [0, 0], sizes = [8, 16], strides = [1, 1]} : vector<8x64xf32> to vector<8x16xf32>
    %120 = arith.negf %119 : vector<8x16xf32>
    %121 = math.exp %120 : vector<8x16xf32>
    %cst_45 = arith.constant 1.000000e+00 : f32
    %122 = vector.broadcast %cst_45 : f32 to vector<8x16xf32>
    %123 = arith.addf %122, %121 : vector<8x16xf32>
    %124 = arith.divf %122, %123 : vector<8x16xf32>
    %125 = vector.extract_strided_slice %118 {offsets = [0, 16], sizes = [8, 16], strides = [1, 1]} : vector<8x64xf32> to vector<8x16xf32>
    %126 = arith.negf %125 : vector<8x16xf32>
    %127 = math.exp %126 : vector<8x16xf32>
    %cst_46 = arith.constant 1.000000e+00 : f32
    %128 = vector.broadcast %cst_46 : f32 to vector<8x16xf32>
    %129 = arith.addf %128, %127 : vector<8x16xf32>
    %130 = arith.divf %128, %129 : vector<8x16xf32>
    %131 = vector.extract_strided_slice %118 {offsets = [0, 32], sizes = [8, 16], strides = [1, 1]} : vector<8x64xf32> to vector<8x16xf32>
    %132 = math.tanh %131 : vector<8x16xf32>
    %133 = vector.extract_strided_slice %118 {offsets = [0, 48], sizes = [8, 16], strides = [1, 1]} : vector<8x64xf32> to vector<8x16xf32>
    %134 = arith.negf %133 : vector<8x16xf32>
    %135 = math.exp %134 : vector<8x16xf32>
    %cst_47 = arith.constant 1.000000e+00 : f32
    %136 = vector.broadcast %cst_47 : f32 to vector<8x16xf32>
    %137 = arith.addf %136, %135 : vector<8x16xf32>
    %138 = arith.divf %136, %137 : vector<8x16xf32>
    %139 = arith.mulf %130, %78 : vector<8x16xf32>
    %140 = arith.mulf %124, %132 : vector<8x16xf32>
    %141 = arith.addf %139, %140 : vector<8x16xf32>
    %142 = math.tanh %141 : vector<8x16xf32>
    %143 = arith.mulf %138, %142 : vector<8x16xf32>
    %144 = arith.maximumf %81, %112 : vector<8x16xf32>
    %145 = arith.maximumf %82, %143 : vector<8x16xf32>
    %c2_i32 = arith.constant 2 : i32
    %146 = arith.index_cast %c2_i32 : i32 to index
    %c0_48 = arith.constant 0 : index
    %c0_49 = arith.constant 0 : index
    %147 = vector.load %arg11[%146, %c0_48, %c0_49] : memref<8x8x64xf32, #tpu.memory_space<vmem>>, vector<1x8x64xf32>
    %148 = vector.shape_cast %147 : vector<1x8x64xf32> to vector<8x64xf32>
    %cst_50 = arith.constant dense<0.000000e+00> : vector<8x64xf32>
    %149 = tpu.matmul %112, %16, %cst_50 {dimension_numbers = #tpu.dot_dimension_numbers<[1], [0], [0], [1], [0, 0, 1, 1], [], []>} : vector<8x16xf32>, vector<16x64xf32>, vector<8x64xf32> -> vector<8x64xf32>
    %150 = arith.addf %148, %149 : vector<8x64xf32>
    %151 = vector.extract_strided_slice %150 {offsets = [0, 0], sizes = [8, 16], strides = [1, 1]} : vector<8x64xf32> to vector<8x16xf32>
    %152 = arith.negf %151 : vector<8x16xf32>
    %153 = math.exp %152 : vector<8x16xf32>
    %cst_51 = arith.constant 1.000000e+00 : f32
    %154 = vector.broadcast %cst_51 : f32 to vector<8x16xf32>
    %155 = arith.addf %154, %153 : vector<8x16xf32>
    %156 = arith.divf %154, %155 : vector<8x16xf32>
    %157 = vector.extract_strided_slice %150 {offsets = [0, 16], sizes = [8, 16], strides = [1, 1]} : vector<8x64xf32> to vector<8x16xf32>
    %158 = arith.negf %157 : vector<8x16xf32>
    %159 = math.exp %158 : vector<8x16xf32>
    %cst_52 = arith.constant 1.000000e+00 : f32
    %160 = vector.broadcast %cst_52 : f32 to vector<8x16xf32>
    %161 = arith.addf %160, %159 : vector<8x16xf32>
    %162 = arith.divf %160, %161 : vector<8x16xf32>
    %163 = vector.extract_strided_slice %150 {offsets = [0, 32], sizes = [8, 16], strides = [1, 1]} : vector<8x64xf32> to vector<8x16xf32>
    %164 = math.tanh %163 : vector<8x16xf32>
    %165 = vector.extract_strided_slice %150 {offsets = [0, 48], sizes = [8, 16], strides = [1, 1]} : vector<8x64xf32> to vector<8x16xf32>
    %166 = arith.negf %165 : vector<8x16xf32>
    %167 = math.exp %166 : vector<8x16xf32>
    %cst_53 = arith.constant 1.000000e+00 : f32
    %168 = vector.broadcast %cst_53 : f32 to vector<8x16xf32>
    %169 = arith.addf %168, %167 : vector<8x16xf32>
    %170 = arith.divf %168, %169 : vector<8x16xf32>
    %171 = arith.mulf %162, %110 : vector<8x16xf32>
    %172 = arith.mulf %156, %164 : vector<8x16xf32>
    %173 = arith.addf %171, %172 : vector<8x16xf32>
    %174 = math.tanh %173 : vector<8x16xf32>
    %175 = arith.mulf %170, %174 : vector<8x16xf32>
    %c7_i32_54 = arith.constant 7 : i32
    %176 = arith.subi %c7_i32_54, %c2_i32 : i32
    %177 = arith.index_cast %176 : i32 to index
    %c0_55 = arith.constant 0 : index
    %c0_56 = arith.constant 0 : index
    %178 = vector.load %arg12[%177, %c0_55, %c0_56] : memref<8x8x64xf32, #tpu.memory_space<vmem>>, vector<1x8x64xf32>
    %179 = vector.shape_cast %178 : vector<1x8x64xf32> to vector<8x64xf32>
    %cst_57 = arith.constant dense<0.000000e+00> : vector<8x64xf32>
    %180 = tpu.matmul %143, %17, %cst_57 {dimension_numbers = #tpu.dot_dimension_numbers<[1], [0], [0], [1], [0, 0, 1, 1], [], []>} : vector<8x16xf32>, vector<16x64xf32>, vector<8x64xf32> -> vector<8x64xf32>
    %181 = arith.addf %179, %180 : vector<8x64xf32>
    %182 = vector.extract_strided_slice %181 {offsets = [0, 0], sizes = [8, 16], strides = [1, 1]} : vector<8x64xf32> to vector<8x16xf32>
    %183 = arith.negf %182 : vector<8x16xf32>
    %184 = math.exp %183 : vector<8x16xf32>
    %cst_58 = arith.constant 1.000000e+00 : f32
    %185 = vector.broadcast %cst_58 : f32 to vector<8x16xf32>
    %186 = arith.addf %185, %184 : vector<8x16xf32>
    %187 = arith.divf %185, %186 : vector<8x16xf32>
    %188 = vector.extract_strided_slice %181 {offsets = [0, 16], sizes = [8, 16], strides = [1, 1]} : vector<8x64xf32> to vector<8x16xf32>
    %189 = arith.negf %188 : vector<8x16xf32>
    %190 = math.exp %189 : vector<8x16xf32>
    %cst_59 = arith.constant 1.000000e+00 : f32
    %191 = vector.broadcast %cst_59 : f32 to vector<8x16xf32>
    %192 = arith.addf %191, %190 : vector<8x16xf32>
    %193 = arith.divf %191, %192 : vector<8x16xf32>
    %194 = vector.extract_strided_slice %181 {offsets = [0, 32], sizes = [8, 16], strides = [1, 1]} : vector<8x64xf32> to vector<8x16xf32>
    %195 = math.tanh %194 : vector<8x16xf32>
    %196 = vector.extract_strided_slice %181 {offsets = [0, 48], sizes = [8, 16], strides = [1, 1]} : vector<8x64xf32> to vector<8x16xf32>
    %197 = arith.negf %196 : vector<8x16xf32>
    %198 = math.exp %197 : vector<8x16xf32>
    %cst_60 = arith.constant 1.000000e+00 : f32
    %199 = vector.broadcast %cst_60 : f32 to vector<8x16xf32>
    %200 = arith.addf %199, %198 : vector<8x16xf32>
    %201 = arith.divf %199, %200 : vector<8x16xf32>
    %202 = arith.mulf %193, %141 : vector<8x16xf32>
    %203 = arith.mulf %187, %195 : vector<8x16xf32>
    %204 = arith.addf %202, %203 : vector<8x16xf32>
    %205 = math.tanh %204 : vector<8x16xf32>
    %206 = arith.mulf %201, %205 : vector<8x16xf32>
    %207 = arith.maximumf %144, %175 : vector<8x16xf32>
    %208 = arith.maximumf %145, %206 : vector<8x16xf32>
    %c3_i32 = arith.constant 3 : i32
    %209 = arith.index_cast %c3_i32 : i32 to index
    %c0_61 = arith.constant 0 : index
    %c0_62 = arith.constant 0 : index
    %210 = vector.load %arg11[%209, %c0_61, %c0_62] : memref<8x8x64xf32, #tpu.memory_space<vmem>>, vector<1x8x64xf32>
    %211 = vector.shape_cast %210 : vector<1x8x64xf32> to vector<8x64xf32>
    %cst_63 = arith.constant dense<0.000000e+00> : vector<8x64xf32>
    %212 = tpu.matmul %175, %16, %cst_63 {dimension_numbers = #tpu.dot_dimension_numbers<[1], [0], [0], [1], [0, 0, 1, 1], [], []>} : vector<8x16xf32>, vector<16x64xf32>, vector<8x64xf32> -> vector<8x64xf32>
    %213 = arith.addf %211, %212 : vector<8x64xf32>
    %214 = vector.extract_strided_slice %213 {offsets = [0, 0], sizes = [8, 16], strides = [1, 1]} : vector<8x64xf32> to vector<8x16xf32>
    %215 = arith.negf %214 : vector<8x16xf32>
    %216 = math.exp %215 : vector<8x16xf32>
    %cst_64 = arith.constant 1.000000e+00 : f32
    %217 = vector.broadcast %cst_64 : f32 to vector<8x16xf32>
    %218 = arith.addf %217, %216 : vector<8x16xf32>
    %219 = arith.divf %217, %218 : vector<8x16xf32>
    %220 = vector.extract_strided_slice %213 {offsets = [0, 16], sizes = [8, 16], strides = [1, 1]} : vector<8x64xf32> to vector<8x16xf32>
    %221 = arith.negf %220 : vector<8x16xf32>
    %222 = math.exp %221 : vector<8x16xf32>
    %cst_65 = arith.constant 1.000000e+00 : f32
    %223 = vector.broadcast %cst_65 : f32 to vector<8x16xf32>
    %224 = arith.addf %223, %222 : vector<8x16xf32>
    %225 = arith.divf %223, %224 : vector<8x16xf32>
    %226 = vector.extract_strided_slice %213 {offsets = [0, 32], sizes = [8, 16], strides = [1, 1]} : vector<8x64xf32> to vector<8x16xf32>
    %227 = math.tanh %226 : vector<8x16xf32>
    %228 = vector.extract_strided_slice %213 {offsets = [0, 48], sizes = [8, 16], strides = [1, 1]} : vector<8x64xf32> to vector<8x16xf32>
    %229 = arith.negf %228 : vector<8x16xf32>
    %230 = math.exp %229 : vector<8x16xf32>
    %cst_66 = arith.constant 1.000000e+00 : f32
    %231 = vector.broadcast %cst_66 : f32 to vector<8x16xf32>
    %232 = arith.addf %231, %230 : vector<8x16xf32>
    %233 = arith.divf %231, %232 : vector<8x16xf32>
    %234 = arith.mulf %225, %173 : vector<8x16xf32>
    %235 = arith.mulf %219, %227 : vector<8x16xf32>
    %236 = arith.addf %234, %235 : vector<8x16xf32>
    %237 = math.tanh %236 : vector<8x16xf32>
    %238 = arith.mulf %233, %237 : vector<8x16xf32>
    %c7_i32_67 = arith.constant 7 : i32
    %239 = arith.subi %c7_i32_67, %c3_i32 : i32
    %240 = arith.index_cast %239 : i32 to index
    %c0_68 = arith.constant 0 : index
    %c0_69 = arith.constant 0 : index
    %241 = vector.load %arg12[%240, %c0_68, %c0_69] : memref<8x8x64xf32, #tpu.memory_space<vmem>>, vector<1x8x64xf32>
    %242 = vector.shape_cast %241 : vector<1x8x64xf32> to vector<8x64xf32>
    %cst_70 = arith.constant dense<0.000000e+00> : vector<8x64xf32>
    %243 = tpu.matmul %206, %17, %cst_70 {dimension_numbers = #tpu.dot_dimension_numbers<[1], [0], [0], [1], [0, 0, 1, 1], [], []>} : vector<8x16xf32>, vector<16x64xf32>, vector<8x64xf32> -> vector<8x64xf32>
    %244 = arith.addf %242, %243 : vector<8x64xf32>
    %245 = vector.extract_strided_slice %244 {offsets = [0, 0], sizes = [8, 16], strides = [1, 1]} : vector<8x64xf32> to vector<8x16xf32>
    %246 = arith.negf %245 : vector<8x16xf32>
    %247 = math.exp %246 : vector<8x16xf32>
    %cst_71 = arith.constant 1.000000e+00 : f32
    %248 = vector.broadcast %cst_71 : f32 to vector<8x16xf32>
    %249 = arith.addf %248, %247 : vector<8x16xf32>
    %250 = arith.divf %248, %249 : vector<8x16xf32>
    %251 = vector.extract_strided_slice %244 {offsets = [0, 16], sizes = [8, 16], strides = [1, 1]} : vector<8x64xf32> to vector<8x16xf32>
    %252 = arith.negf %251 : vector<8x16xf32>
    %253 = math.exp %252 : vector<8x16xf32>
    %cst_72 = arith.constant 1.000000e+00 : f32
    %254 = vector.broadcast %cst_72 : f32 to vector<8x16xf32>
    %255 = arith.addf %254, %253 : vector<8x16xf32>
    %256 = arith.divf %254, %255 : vector<8x16xf32>
    %257 = vector.extract_strided_slice %244 {offsets = [0, 32], sizes = [8, 16], strides = [1, 1]} : vector<8x64xf32> to vector<8x16xf32>
    %258 = math.tanh %257 : vector<8x16xf32>
    %259 = vector.extract_strided_slice %244 {offsets = [0, 48], sizes = [8, 16], strides = [1, 1]} : vector<8x64xf32> to vector<8x16xf32>
    %260 = arith.negf %259 : vector<8x16xf32>
    %261 = math.exp %260 : vector<8x16xf32>
    %cst_73 = arith.constant 1.000000e+00 : f32
    %262 = vector.broadcast %cst_73 : f32 to vector<8x16xf32>
    %263 = arith.addf %262, %261 : vector<8x16xf32>
    %264 = arith.divf %262, %263 : vector<8x16xf32>
    %265 = arith.mulf %256, %204 : vector<8x16xf32>
    %266 = arith.mulf %250, %258 : vector<8x16xf32>
    %267 = arith.addf %265, %266 : vector<8x16xf32>
    %268 = math.tanh %267 : vector<8x16xf32>
    %269 = arith.mulf %264, %268 : vector<8x16xf32>
    %270 = arith.maximumf %207, %238 : vector<8x16xf32>
    %271 = arith.maximumf %208, %269 : vector<8x16xf32>
    %c4_i32 = arith.constant 4 : i32
    %272 = arith.index_cast %c4_i32 : i32 to index
    %c0_74 = arith.constant 0 : index
    %c0_75 = arith.constant 0 : index
    %273 = vector.load %arg11[%272, %c0_74, %c0_75] : memref<8x8x64xf32, #tpu.memory_space<vmem>>, vector<1x8x64xf32>
    %274 = vector.shape_cast %273 : vector<1x8x64xf32> to vector<8x64xf32>
    %cst_76 = arith.constant dense<0.000000e+00> : vector<8x64xf32>
    %275 = tpu.matmul %238, %16, %cst_76 {dimension_numbers = #tpu.dot_dimension_numbers<[1], [0], [0], [1], [0, 0, 1, 1], [], []>} : vector<8x16xf32>, vector<16x64xf32>, vector<8x64xf32> -> vector<8x64xf32>
    %276 = arith.addf %274, %275 : vector<8x64xf32>
    %277 = vector.extract_strided_slice %276 {offsets = [0, 0], sizes = [8, 16], strides = [1, 1]} : vector<8x64xf32> to vector<8x16xf32>
    %278 = arith.negf %277 : vector<8x16xf32>
    %279 = math.exp %278 : vector<8x16xf32>
    %cst_77 = arith.constant 1.000000e+00 : f32
    %280 = vector.broadcast %cst_77 : f32 to vector<8x16xf32>
    %281 = arith.addf %280, %279 : vector<8x16xf32>
    %282 = arith.divf %280, %281 : vector<8x16xf32>
    %283 = vector.extract_strided_slice %276 {offsets = [0, 16], sizes = [8, 16], strides = [1, 1]} : vector<8x64xf32> to vector<8x16xf32>
    %284 = arith.negf %283 : vector<8x16xf32>
    %285 = math.exp %284 : vector<8x16xf32>
    %cst_78 = arith.constant 1.000000e+00 : f32
    %286 = vector.broadcast %cst_78 : f32 to vector<8x16xf32>
    %287 = arith.addf %286, %285 : vector<8x16xf32>
    %288 = arith.divf %286, %287 : vector<8x16xf32>
    %289 = vector.extract_strided_slice %276 {offsets = [0, 32], sizes = [8, 16], strides = [1, 1]} : vector<8x64xf32> to vector<8x16xf32>
    %290 = math.tanh %289 : vector<8x16xf32>
    %291 = vector.extract_strided_slice %276 {offsets = [0, 48], sizes = [8, 16], strides = [1, 1]} : vector<8x64xf32> to vector<8x16xf32>
    %292 = arith.negf %291 : vector<8x16xf32>
    %293 = math.exp %292 : vector<8x16xf32>
    %cst_79 = arith.constant 1.000000e+00 : f32
    %294 = vector.broadcast %cst_79 : f32 to vector<8x16xf32>
    %295 = arith.addf %294, %293 : vector<8x16xf32>
    %296 = arith.divf %294, %295 : vector<8x16xf32>
    %297 = arith.mulf %288, %236 : vector<8x16xf32>
    %298 = arith.mulf %282, %290 : vector<8x16xf32>
    %299 = arith.addf %297, %298 : vector<8x16xf32>
    %300 = math.tanh %299 : vector<8x16xf32>
    %301 = arith.mulf %296, %300 : vector<8x16xf32>
    %c7_i32_80 = arith.constant 7 : i32
    %302 = arith.subi %c7_i32_80, %c4_i32 : i32
    %303 = arith.index_cast %302 : i32 to index
    %c0_81 = arith.constant 0 : index
    %c0_82 = arith.constant 0 : index
    %304 = vector.load %arg12[%303, %c0_81, %c0_82] : memref<8x8x64xf32, #tpu.memory_space<vmem>>, vector<1x8x64xf32>
    %305 = vector.shape_cast %304 : vector<1x8x64xf32> to vector<8x64xf32>
    %cst_83 = arith.constant dense<0.000000e+00> : vector<8x64xf32>
    %306 = tpu.matmul %269, %17, %cst_83 {dimension_numbers = #tpu.dot_dimension_numbers<[1], [0], [0], [1], [0, 0, 1, 1], [], []>} : vector<8x16xf32>, vector<16x64xf32>, vector<8x64xf32> -> vector<8x64xf32>
    %307 = arith.addf %305, %306 : vector<8x64xf32>
    %308 = vector.extract_strided_slice %307 {offsets = [0, 0], sizes = [8, 16], strides = [1, 1]} : vector<8x64xf32> to vector<8x16xf32>
    %309 = arith.negf %308 : vector<8x16xf32>
    %310 = math.exp %309 : vector<8x16xf32>
    %cst_84 = arith.constant 1.000000e+00 : f32
    %311 = vector.broadcast %cst_84 : f32 to vector<8x16xf32>
    %312 = arith.addf %311, %310 : vector<8x16xf32>
    %313 = arith.divf %311, %312 : vector<8x16xf32>
    %314 = vector.extract_strided_slice %307 {offsets = [0, 16], sizes = [8, 16], strides = [1, 1]} : vector<8x64xf32> to vector<8x16xf32>
    %315 = arith.negf %314 : vector<8x16xf32>
    %316 = math.exp %315 : vector<8x16xf32>
    %cst_85 = arith.constant 1.000000e+00 : f32
    %317 = vector.broadcast %cst_85 : f32 to vector<8x16xf32>
    %318 = arith.addf %317, %316 : vector<8x16xf32>
    %319 = arith.divf %317, %318 : vector<8x16xf32>
    %320 = vector.extract_strided_slice %307 {offsets = [0, 32], sizes = [8, 16], strides = [1, 1]} : vector<8x64xf32> to vector<8x16xf32>
    %321 = math.tanh %320 : vector<8x16xf32>
    %322 = vector.extract_strided_slice %307 {offsets = [0, 48], sizes = [8, 16], strides = [1, 1]} : vector<8x64xf32> to vector<8x16xf32>
    %323 = arith.negf %322 : vector<8x16xf32>
    %324 = math.exp %323 : vector<8x16xf32>
    %cst_86 = arith.constant 1.000000e+00 : f32
    %325 = vector.broadcast %cst_86 : f32 to vector<8x16xf32>
    %326 = arith.addf %325, %324 : vector<8x16xf32>
    %327 = arith.divf %325, %326 : vector<8x16xf32>
    %328 = arith.mulf %319, %267 : vector<8x16xf32>
    %329 = arith.mulf %313, %321 : vector<8x16xf32>
    %330 = arith.addf %328, %329 : vector<8x16xf32>
    %331 = math.tanh %330 : vector<8x16xf32>
    %332 = arith.mulf %327, %331 : vector<8x16xf32>
    %333 = arith.maximumf %270, %301 : vector<8x16xf32>
    %334 = arith.maximumf %271, %332 : vector<8x16xf32>
    %c5_i32 = arith.constant 5 : i32
    %335 = arith.index_cast %c5_i32 : i32 to index
    %c0_87 = arith.constant 0 : index
    %c0_88 = arith.constant 0 : index
    %336 = vector.load %arg11[%335, %c0_87, %c0_88] : memref<8x8x64xf32, #tpu.memory_space<vmem>>, vector<1x8x64xf32>
    %337 = vector.shape_cast %336 : vector<1x8x64xf32> to vector<8x64xf32>
    %cst_89 = arith.constant dense<0.000000e+00> : vector<8x64xf32>
    %338 = tpu.matmul %301, %16, %cst_89 {dimension_numbers = #tpu.dot_dimension_numbers<[1], [0], [0], [1], [0, 0, 1, 1], [], []>} : vector<8x16xf32>, vector<16x64xf32>, vector<8x64xf32> -> vector<8x64xf32>
    %339 = arith.addf %337, %338 : vector<8x64xf32>
    %340 = vector.extract_strided_slice %339 {offsets = [0, 0], sizes = [8, 16], strides = [1, 1]} : vector<8x64xf32> to vector<8x16xf32>
    %341 = arith.negf %340 : vector<8x16xf32>
    %342 = math.exp %341 : vector<8x16xf32>
    %cst_90 = arith.constant 1.000000e+00 : f32
    %343 = vector.broadcast %cst_90 : f32 to vector<8x16xf32>
    %344 = arith.addf %343, %342 : vector<8x16xf32>
    %345 = arith.divf %343, %344 : vector<8x16xf32>
    %346 = vector.extract_strided_slice %339 {offsets = [0, 16], sizes = [8, 16], strides = [1, 1]} : vector<8x64xf32> to vector<8x16xf32>
    %347 = arith.negf %346 : vector<8x16xf32>
    %348 = math.exp %347 : vector<8x16xf32>
    %cst_91 = arith.constant 1.000000e+00 : f32
    %349 = vector.broadcast %cst_91 : f32 to vector<8x16xf32>
    %350 = arith.addf %349, %348 : vector<8x16xf32>
    %351 = arith.divf %349, %350 : vector<8x16xf32>
    %352 = vector.extract_strided_slice %339 {offsets = [0, 32], sizes = [8, 16], strides = [1, 1]} : vector<8x64xf32> to vector<8x16xf32>
    %353 = math.tanh %352 : vector<8x16xf32>
    %354 = vector.extract_strided_slice %339 {offsets = [0, 48], sizes = [8, 16], strides = [1, 1]} : vector<8x64xf32> to vector<8x16xf32>
    %355 = arith.negf %354 : vector<8x16xf32>
    %356 = math.exp %355 : vector<8x16xf32>
    %cst_92 = arith.constant 1.000000e+00 : f32
    %357 = vector.broadcast %cst_92 : f32 to vector<8x16xf32>
    %358 = arith.addf %357, %356 : vector<8x16xf32>
    %359 = arith.divf %357, %358 : vector<8x16xf32>
    %360 = arith.mulf %351, %299 : vector<8x16xf32>
    %361 = arith.mulf %345, %353 : vector<8x16xf32>
    %362 = arith.addf %360, %361 : vector<8x16xf32>
    %363 = math.tanh %362 : vector<8x16xf32>
    %364 = arith.mulf %359, %363 : vector<8x16xf32>
    %c7_i32_93 = arith.constant 7 : i32
    %365 = arith.subi %c7_i32_93, %c5_i32 : i32
    %366 = arith.index_cast %365 : i32 to index
    %c0_94 = arith.constant 0 : index
    %c0_95 = arith.constant 0 : index
    %367 = vector.load %arg12[%366, %c0_94, %c0_95] : memref<8x8x64xf32, #tpu.memory_space<vmem>>, vector<1x8x64xf32>
    %368 = vector.shape_cast %367 : vector<1x8x64xf32> to vector<8x64xf32>
    %cst_96 = arith.constant dense<0.000000e+00> : vector<8x64xf32>
    %369 = tpu.matmul %332, %17, %cst_96 {dimension_numbers = #tpu.dot_dimension_numbers<[1], [0], [0], [1], [0, 0, 1, 1], [], []>} : vector<8x16xf32>, vector<16x64xf32>, vector<8x64xf32> -> vector<8x64xf32>
    %370 = arith.addf %368, %369 : vector<8x64xf32>
    %371 = vector.extract_strided_slice %370 {offsets = [0, 0], sizes = [8, 16], strides = [1, 1]} : vector<8x64xf32> to vector<8x16xf32>
    %372 = arith.negf %371 : vector<8x16xf32>
    %373 = math.exp %372 : vector<8x16xf32>
    %cst_97 = arith.constant 1.000000e+00 : f32
    %374 = vector.broadcast %cst_97 : f32 to vector<8x16xf32>
    %375 = arith.addf %374, %373 : vector<8x16xf32>
    %376 = arith.divf %374, %375 : vector<8x16xf32>
    %377 = vector.extract_strided_slice %370 {offsets = [0, 16], sizes = [8, 16], strides = [1, 1]} : vector<8x64xf32> to vector<8x16xf32>
    %378 = arith.negf %377 : vector<8x16xf32>
    %379 = math.exp %378 : vector<8x16xf32>
    %cst_98 = arith.constant 1.000000e+00 : f32
    %380 = vector.broadcast %cst_98 : f32 to vector<8x16xf32>
    %381 = arith.addf %380, %379 : vector<8x16xf32>
    %382 = arith.divf %380, %381 : vector<8x16xf32>
    %383 = vector.extract_strided_slice %370 {offsets = [0, 32], sizes = [8, 16], strides = [1, 1]} : vector<8x64xf32> to vector<8x16xf32>
    %384 = math.tanh %383 : vector<8x16xf32>
    %385 = vector.extract_strided_slice %370 {offsets = [0, 48], sizes = [8, 16], strides = [1, 1]} : vector<8x64xf32> to vector<8x16xf32>
    %386 = arith.negf %385 : vector<8x16xf32>
    %387 = math.exp %386 : vector<8x16xf32>
    %cst_99 = arith.constant 1.000000e+00 : f32
    %388 = vector.broadcast %cst_99 : f32 to vector<8x16xf32>
    %389 = arith.addf %388, %387 : vector<8x16xf32>
    %390 = arith.divf %388, %389 : vector<8x16xf32>
    %391 = arith.mulf %382, %330 : vector<8x16xf32>
    %392 = arith.mulf %376, %384 : vector<8x16xf32>
    %393 = arith.addf %391, %392 : vector<8x16xf32>
    %394 = math.tanh %393 : vector<8x16xf32>
    %395 = arith.mulf %390, %394 : vector<8x16xf32>
    %396 = arith.maximumf %333, %364 : vector<8x16xf32>
    %397 = arith.maximumf %334, %395 : vector<8x16xf32>
    %c6_i32 = arith.constant 6 : i32
    %398 = arith.index_cast %c6_i32 : i32 to index
    %c0_100 = arith.constant 0 : index
    %c0_101 = arith.constant 0 : index
    %399 = vector.load %arg11[%398, %c0_100, %c0_101] : memref<8x8x64xf32, #tpu.memory_space<vmem>>, vector<1x8x64xf32>
    %400 = vector.shape_cast %399 : vector<1x8x64xf32> to vector<8x64xf32>
    %cst_102 = arith.constant dense<0.000000e+00> : vector<8x64xf32>
    %401 = tpu.matmul %364, %16, %cst_102 {dimension_numbers = #tpu.dot_dimension_numbers<[1], [0], [0], [1], [0, 0, 1, 1], [], []>} : vector<8x16xf32>, vector<16x64xf32>, vector<8x64xf32> -> vector<8x64xf32>
    %402 = arith.addf %400, %401 : vector<8x64xf32>
    %403 = vector.extract_strided_slice %402 {offsets = [0, 0], sizes = [8, 16], strides = [1, 1]} : vector<8x64xf32> to vector<8x16xf32>
    %404 = arith.negf %403 : vector<8x16xf32>
    %405 = math.exp %404 : vector<8x16xf32>
    %cst_103 = arith.constant 1.000000e+00 : f32
    %406 = vector.broadcast %cst_103 : f32 to vector<8x16xf32>
    %407 = arith.addf %406, %405 : vector<8x16xf32>
    %408 = arith.divf %406, %407 : vector<8x16xf32>
    %409 = vector.extract_strided_slice %402 {offsets = [0, 16], sizes = [8, 16], strides = [1, 1]} : vector<8x64xf32> to vector<8x16xf32>
    %410 = arith.negf %409 : vector<8x16xf32>
    %411 = math.exp %410 : vector<8x16xf32>
    %cst_104 = arith.constant 1.000000e+00 : f32
    %412 = vector.broadcast %cst_104 : f32 to vector<8x16xf32>
    %413 = arith.addf %412, %411 : vector<8x16xf32>
    %414 = arith.divf %412, %413 : vector<8x16xf32>
    %415 = vector.extract_strided_slice %402 {offsets = [0, 32], sizes = [8, 16], strides = [1, 1]} : vector<8x64xf32> to vector<8x16xf32>
    %416 = math.tanh %415 : vector<8x16xf32>
    %417 = vector.extract_strided_slice %402 {offsets = [0, 48], sizes = [8, 16], strides = [1, 1]} : vector<8x64xf32> to vector<8x16xf32>
    %418 = arith.negf %417 : vector<8x16xf32>
    %419 = math.exp %418 : vector<8x16xf32>
    %cst_105 = arith.constant 1.000000e+00 : f32
    %420 = vector.broadcast %cst_105 : f32 to vector<8x16xf32>
    %421 = arith.addf %420, %419 : vector<8x16xf32>
    %422 = arith.divf %420, %421 : vector<8x16xf32>
    %423 = arith.mulf %414, %362 : vector<8x16xf32>
    %424 = arith.mulf %408, %416 : vector<8x16xf32>
    %425 = arith.addf %423, %424 : vector<8x16xf32>
    %426 = math.tanh %425 : vector<8x16xf32>
    %427 = arith.mulf %422, %426 : vector<8x16xf32>
    %c7_i32_106 = arith.constant 7 : i32
    %428 = arith.subi %c7_i32_106, %c6_i32 : i32
    %429 = arith.index_cast %428 : i32 to index
    %c0_107 = arith.constant 0 : index
    %c0_108 = arith.constant 0 : index
    %430 = vector.load %arg12[%429, %c0_107, %c0_108] : memref<8x8x64xf32, #tpu.memory_space<vmem>>, vector<1x8x64xf32>
    %431 = vector.shape_cast %430 : vector<1x8x64xf32> to vector<8x64xf32>
    %cst_109 = arith.constant dense<0.000000e+00> : vector<8x64xf32>
    %432 = tpu.matmul %395, %17, %cst_109 {dimension_numbers = #tpu.dot_dimension_numbers<[1], [0], [0], [1], [0, 0, 1, 1], [], []>} : vector<8x16xf32>, vector<16x64xf32>, vector<8x64xf32> -> vector<8x64xf32>
    %433 = arith.addf %431, %432 : vector<8x64xf32>
    %434 = vector.extract_strided_slice %433 {offsets = [0, 0], sizes = [8, 16], strides = [1, 1]} : vector<8x64xf32> to vector<8x16xf32>
    %435 = arith.negf %434 : vector<8x16xf32>
    %436 = math.exp %435 : vector<8x16xf32>
    %cst_110 = arith.constant 1.000000e+00 : f32
    %437 = vector.broadcast %cst_110 : f32 to vector<8x16xf32>
    %438 = arith.addf %437, %436 : vector<8x16xf32>
    %439 = arith.divf %437, %438 : vector<8x16xf32>
    %440 = vector.extract_strided_slice %433 {offsets = [0, 16], sizes = [8, 16], strides = [1, 1]} : vector<8x64xf32> to vector<8x16xf32>
    %441 = arith.negf %440 : vector<8x16xf32>
    %442 = math.exp %441 : vector<8x16xf32>
    %cst_111 = arith.constant 1.000000e+00 : f32
    %443 = vector.broadcast %cst_111 : f32 to vector<8x16xf32>
    %444 = arith.addf %443, %442 : vector<8x16xf32>
    %445 = arith.divf %443, %444 : vector<8x16xf32>
    %446 = vector.extract_strided_slice %433 {offsets = [0, 32], sizes = [8, 16], strides = [1, 1]} : vector<8x64xf32> to vector<8x16xf32>
    %447 = math.tanh %446 : vector<8x16xf32>
    %448 = vector.extract_strided_slice %433 {offsets = [0, 48], sizes = [8, 16], strides = [1, 1]} : vector<8x64xf32> to vector<8x16xf32>
    %449 = arith.negf %448 : vector<8x16xf32>
    %450 = math.exp %449 : vector<8x16xf32>
    %cst_112 = arith.constant 1.000000e+00 : f32
    %451 = vector.broadcast %cst_112 : f32 to vector<8x16xf32>
    %452 = arith.addf %451, %450 : vector<8x16xf32>
    %453 = arith.divf %451, %452 : vector<8x16xf32>
    %454 = arith.mulf %445, %393 : vector<8x16xf32>
    %455 = arith.mulf %439, %447 : vector<8x16xf32>
    %456 = arith.addf %454, %455 : vector<8x16xf32>
    %457 = math.tanh %456 : vector<8x16xf32>
    %458 = arith.mulf %453, %457 : vector<8x16xf32>
    %459 = arith.maximumf %396, %427 : vector<8x16xf32>
    %460 = arith.maximumf %397, %458 : vector<8x16xf32>
    %c7_i32_113 = arith.constant 7 : i32
    %461 = arith.index_cast %c7_i32_113 : i32 to index
    %c0_114 = arith.constant 0 : index
    %c0_115 = arith.constant 0 : index
    %462 = vector.load %arg11[%461, %c0_114, %c0_115] : memref<8x8x64xf32, #tpu.memory_space<vmem>>, vector<1x8x64xf32>
    %463 = vector.shape_cast %462 : vector<1x8x64xf32> to vector<8x64xf32>
    %cst_116 = arith.constant dense<0.000000e+00> : vector<8x64xf32>
    %464 = tpu.matmul %427, %16, %cst_116 {dimension_numbers = #tpu.dot_dimension_numbers<[1], [0], [0], [1], [0, 0, 1, 1], [], []>} : vector<8x16xf32>, vector<16x64xf32>, vector<8x64xf32> -> vector<8x64xf32>
    %465 = arith.addf %463, %464 : vector<8x64xf32>
    %466 = vector.extract_strided_slice %465 {offsets = [0, 0], sizes = [8, 16], strides = [1, 1]} : vector<8x64xf32> to vector<8x16xf32>
    %467 = arith.negf %466 : vector<8x16xf32>
    %468 = math.exp %467 : vector<8x16xf32>
    %cst_117 = arith.constant 1.000000e+00 : f32
    %469 = vector.broadcast %cst_117 : f32 to vector<8x16xf32>
    %470 = arith.addf %469, %468 : vector<8x16xf32>
    %471 = arith.divf %469, %470 : vector<8x16xf32>
    %472 = vector.extract_strided_slice %465 {offsets = [0, 16], sizes = [8, 16], strides = [1, 1]} : vector<8x64xf32> to vector<8x16xf32>
    %473 = arith.negf %472 : vector<8x16xf32>
    %474 = math.exp %473 : vector<8x16xf32>
    %cst_118 = arith.constant 1.000000e+00 : f32
    %475 = vector.broadcast %cst_118 : f32 to vector<8x16xf32>
    %476 = arith.addf %475, %474 : vector<8x16xf32>
    %477 = arith.divf %475, %476 : vector<8x16xf32>
    %478 = vector.extract_strided_slice %465 {offsets = [0, 32], sizes = [8, 16], strides = [1, 1]} : vector<8x64xf32> to vector<8x16xf32>
    %479 = math.tanh %478 : vector<8x16xf32>
    %480 = vector.extract_strided_slice %465 {offsets = [0, 48], sizes = [8, 16], strides = [1, 1]} : vector<8x64xf32> to vector<8x16xf32>
    %481 = arith.negf %480 : vector<8x16xf32>
    %482 = math.exp %481 : vector<8x16xf32>
    %cst_119 = arith.constant 1.000000e+00 : f32
    %483 = vector.broadcast %cst_119 : f32 to vector<8x16xf32>
    %484 = arith.addf %483, %482 : vector<8x16xf32>
    %485 = arith.divf %483, %484 : vector<8x16xf32>
    %486 = arith.mulf %477, %425 : vector<8x16xf32>
    %487 = arith.mulf %471, %479 : vector<8x16xf32>
    %488 = arith.addf %486, %487 : vector<8x16xf32>
    %489 = math.tanh %488 : vector<8x16xf32>
    %490 = arith.mulf %485, %489 : vector<8x16xf32>
    %c7_i32_120 = arith.constant 7 : i32
    %491 = arith.subi %c7_i32_120, %c7_i32_113 : i32
    %492 = arith.index_cast %491 : i32 to index
    %c0_121 = arith.constant 0 : index
    %c0_122 = arith.constant 0 : index
    %493 = vector.load %arg12[%492, %c0_121, %c0_122] : memref<8x8x64xf32, #tpu.memory_space<vmem>>, vector<1x8x64xf32>
    %494 = vector.shape_cast %493 : vector<1x8x64xf32> to vector<8x64xf32>
    %cst_123 = arith.constant dense<0.000000e+00> : vector<8x64xf32>
    %495 = tpu.matmul %458, %17, %cst_123 {dimension_numbers = #tpu.dot_dimension_numbers<[1], [0], [0], [1], [0, 0, 1, 1], [], []>} : vector<8x16xf32>, vector<16x64xf32>, vector<8x64xf32> -> vector<8x64xf32>
    %496 = arith.addf %494, %495 : vector<8x64xf32>
    %497 = vector.extract_strided_slice %496 {offsets = [0, 0], sizes = [8, 16], strides = [1, 1]} : vector<8x64xf32> to vector<8x16xf32>
    %498 = arith.negf %497 : vector<8x16xf32>
    %499 = math.exp %498 : vector<8x16xf32>
    %cst_124 = arith.constant 1.000000e+00 : f32
    %500 = vector.broadcast %cst_124 : f32 to vector<8x16xf32>
    %501 = arith.addf %500, %499 : vector<8x16xf32>
    %502 = arith.divf %500, %501 : vector<8x16xf32>
    %503 = vector.extract_strided_slice %496 {offsets = [0, 16], sizes = [8, 16], strides = [1, 1]} : vector<8x64xf32> to vector<8x16xf32>
    %504 = arith.negf %503 : vector<8x16xf32>
    %505 = math.exp %504 : vector<8x16xf32>
    %cst_125 = arith.constant 1.000000e+00 : f32
    %506 = vector.broadcast %cst_125 : f32 to vector<8x16xf32>
    %507 = arith.addf %506, %505 : vector<8x16xf32>
    %508 = arith.divf %506, %507 : vector<8x16xf32>
    %509 = vector.extract_strided_slice %496 {offsets = [0, 32], sizes = [8, 16], strides = [1, 1]} : vector<8x64xf32> to vector<8x16xf32>
    %510 = math.tanh %509 : vector<8x16xf32>
    %511 = vector.extract_strided_slice %496 {offsets = [0, 48], sizes = [8, 16], strides = [1, 1]} : vector<8x64xf32> to vector<8x16xf32>
    %512 = arith.negf %511 : vector<8x16xf32>
    %513 = math.exp %512 : vector<8x16xf32>
    %cst_126 = arith.constant 1.000000e+00 : f32
    %514 = vector.broadcast %cst_126 : f32 to vector<8x16xf32>
    %515 = arith.addf %514, %513 : vector<8x16xf32>
    %516 = arith.divf %514, %515 : vector<8x16xf32>
    %517 = arith.mulf %508, %456 : vector<8x16xf32>
    %518 = arith.mulf %502, %510 : vector<8x16xf32>
    %519 = arith.addf %517, %518 : vector<8x16xf32>
    %520 = math.tanh %519 : vector<8x16xf32>
    %521 = arith.mulf %516, %520 : vector<8x16xf32>
    %522 = arith.maximumf %459, %490 : vector<8x16xf32>
    %523 = arith.maximumf %460, %521 : vector<8x16xf32>
    %c8_i32 = arith.constant 8 : i32
    %c0_127 = arith.constant 0 : index
    %c0_128 = arith.constant 0 : index
    %c0_129 = arith.constant 0 : index
    %524 = vector.load %arg1[%c0_127, %c0_128, %c0_129] : memref<8x8x16xf32, #tpu.memory_space<vmem>>, vector<8x8x16xf32>
    %cst_130 = arith.constant dense<0xFF800000> : vector<8x16xf32>
    %525 = vector.multi_reduction <maximumf>, %524, %cst_130 [0] : vector<8x8x16xf32> to vector<8x16xf32>
    %526 = tpu.concatenate %525, %522, %523 in 1 : vector<8x16xf32>, vector<8x16xf32>, vector<8x16xf32> -> vector<8x48xf32>
    %cst_131 = arith.constant 0.000000e+00 : f32
    %527 = vector.broadcast %cst_131 : f32 to vector<8x48xf32>
    %528 = arith.maximumf %526, %527 : vector<8x48xf32>
    %c0_132 = arith.constant 0 : index
    %c0_133 = arith.constant 0 : index
    %529 = vector.load %arg8[%c0_132, %c0_133] : memref<48x128xf32, #tpu.memory_space<vmem>>, vector<48x128xf32>
    %cst_134 = arith.constant dense<0.000000e+00> : vector<8x128xf32>
    %530 = tpu.matmul %528, %529, %cst_134 {dimension_numbers = #tpu.dot_dimension_numbers<[1], [0], [0], [1], [0, 0, 1, 1], [], []>} : vector<8x48xf32>, vector<48x128xf32>, vector<8x128xf32> -> vector<8x128xf32>
    %c0_135 = arith.constant 0 : index
    %c0_136 = arith.constant 0 : index
    %531 = vector.load %arg9[%c0_135, %c0_136] : memref<1x128xf32, #tpu.memory_space<vmem>>, vector<1x128xf32>
    %532 = vector.broadcast %531 : vector<1x128xf32> to vector<8x128xf32>
    %533 = arith.addf %530, %532 : vector<8x128xf32>
    %c0_137 = arith.constant 0 : index
    %c0_138 = arith.constant 0 : index
    %534 = vector.load %arg10[%c0_137, %c0_138] : memref<8x128xf32, #tpu.memory_space<vmem>>, vector<8x128xf32>
    tpu.vector_store %arg10[%c0_137, %c0_138], %533 {strides = array<i32>} : memref<8x128xf32, #tpu.memory_space<vmem>>, vector<8x128xf32>,
    return
  }
  func.func @transform_0(%arg0: i32) -> (i32, i32, i32) {
    %c0_i32 = arith.constant 0 : i32
    %c0_i32_0 = arith.constant 0 : i32
    %c0_i32_1 = arith.constant 0 : i32
    return %c0_i32, %arg0, %c0_i32_0 : i32, i32, i32
  }
  func.func @transform_1(%arg0: i32) -> (i32, i32) {
    %c0_i32 = arith.constant 0 : i32
    %c0_i32_0 = arith.constant 0 : i32
    %c0_i32_1 = arith.constant 0 : i32
    return %c0_i32, %c0_i32_0 : i32, i32
  }
  func.func @transform_2(%arg0: i32) -> (i32, i32) {
    %c0_i32 = arith.constant 0 : i32
    %c0_i32_0 = arith.constant 0 : i32
    %c0_i32_1 = arith.constant 0 : i32
    return %c0_i32, %c0_i32_0 : i32, i32
  }
  func.func @transform_3(%arg0: i32) -> (i32, i32) {
    %c0_i32 = arith.constant 0 : i32
    %c0_i32_0 = arith.constant 0 : i32
    %c0_i32_1 = arith.constant 0 : i32
    return %c0_i32, %c0_i32_0 : i32, i32
  }
  func.func @transform_4(%arg0: i32) -> (i32, i32) {
    %c0_i32 = arith.constant 0 : i32
    %c0_i32_0 = arith.constant 0 : i32
    %c0_i32_1 = arith.constant 0 : i32
    return %c0_i32, %c0_i32_0 : i32, i32
  }
  func.func @transform_5(%arg0: i32) -> (i32, i32) {
    %c0_i32 = arith.constant 0 : i32
    %c0_i32_0 = arith.constant 0 : i32
    %c0_i32_1 = arith.constant 0 : i32
    return %c0_i32, %c0_i32_0 : i32, i32
  }
  func.func @transform_6(%arg0: i32) -> (i32, i32) {
    %c0_i32 = arith.constant 0 : i32
    %c0_i32_0 = arith.constant 0 : i32
    %c0_i32_1 = arith.constant 0 : i32
    return %c0_i32, %c0_i32_0 : i32, i32
  }
  func.func @transform_7(%arg0: i32) -> (i32, i32) {
    %c0_i32 = arith.constant 0 : i32
    %c0_i32_0 = arith.constant 0 : i32
    %c0_i32_1 = arith.constant 0 : i32
    return %c0_i32, %c0_i32_0 : i32, i32
  }
  func.func @transform_8(%arg0: i32) -> (i32, i32) {
    %c0_i32 = arith.constant 0 : i32
    %c0_i32_0 = arith.constant 0 : i32
    %c0_i32_1 = arith.constant 0 : i32
    return %c0_i32, %c0_i32_0 : i32, i32
  }
  func.func @transform_9(%arg0: i32) -> (i32, i32) {
    %c0_i32 = arith.constant 0 : i32
    %c0_i32_0 = arith.constant 0 : i32
    return %arg0, %c0_i32 : i32, i32
  }
}

</mosaic_0001>

<bundles_post_ra>
// kernel: tpu_custom_call.1
= control target key start
LH: loop header
LB: loop body
LE: loop exit
PB: predicated region body
PF: predicated region fallthrough
CT: control target
= control target key end

     0   :  { %14 = vsyncpa [#allocation5], 0  ;;  %s3418_s0 = inlined_call_operand.hbm [shape: f32[8,8,16], index: 0, kind: input, shape index: {}]   ;;  %s3419_s1 = inlined_call_operand.hbm [shape: f32[16,64], index: 1, kind: input, shape index: {}]   ;;  %s3420_s2 = inlined_call_operand.hbm [shape: f32[16,64], index: 2, kind: input, shape index: {}]   ;;  %s3421_s3 = inlined_call_operand.hbm [shape: f32[1,64], index: 3, kind: input, shape index: {}]   ;;  %s3422_s4 = inlined_call_operand.hbm [shape: f32[16,64], index: 4, kind: input, shape index: {}]   ;;  %s3423_s5 = inlined_call_operand.hbm [shape: f32[16,64], index: 5, kind: input, shape index: {}]   ;;  %s3424_s6 = inlined_call_operand.hbm [shape: f32[1,64], index: 6, kind: input, shape index: {}]   ;;  %s3425_s7 = inlined_call_operand.hbm [shape: f32[48,128], index: 7, kind: input, shape index: {}]   ;;  %s3426_s8 = inlined_call_operand.hbm [shape: f32[1,128], index: 8, kind: input, shape index: {}]   ;;  %s3427_s9 = inlined_call_operand.hbm [shape: f32[8,128], index: 9, kind: output, shape index: {}]  }
   0x1   :  { %15 = vsyncpa [#allocation8], 0 }
   0x2   :  { %16 = vsyncpa [#allocation11], 0 }
   0x3   :  { %17 = vsyncpa [#allocation14], 0 }
   0x4   :  { %18 = vsyncpa [#allocation17], 0 }
   0x5   :  { %19 = vsyncpa [#allocation6], 0  ;;  %s2945_s30 = smov [#allocation7]   ;;  %s2946_s11 = smov [#allocation10]  }
   0x6   :  { %s37_s10 = sshll.u32 %s2945_s30, 4  ;;  %s62_s12 = sshll.u32 %s2946_s11, 4  ;;  %s38_s10 = int_to_ptr.vmem [resolvable:$true] %s37_s10  ;;  %s3015_s12 = int_to_ptr.vmem [resolvable:$true] %s62_s12 }
   0x7   :  { %s2713_s15 = scalar_lea.hbm %s3419_s1, 256 }
   0x8   :  { %p2714_p0 = scmp.ne.s32.totalorder %s3419_s1, %s2713_s15  ;;  %p2717_p1 = scmp.lt.u32.totalorder %s2713_s15, %s3419_s1 }
   0xa   :  { %p2719_p2 = pnand %p2717_p1, %p2714_p0 }
   0xc   :  { %2722 = shalt.err (!%p2719_p2)
}
   0xd   :  { %s2723_s20 = scalar_lea.vmem %s38_s10, 256  ;;  %p2728_p4 = scmp.lt.s32.totalorder %s38_s10, %s38_s10 }
   0xe   :  { %p2724_p3 = scmp.ne.s32.totalorder %s38_s10, %s2723_s20  ;;  %p2729_p5 = scmp.lt.s32.totalorder %s2723_s20, %s2723_s20 }
  0x10   :  { %p2730_p6 = por %p2729_p5, %p2728_p4 }
  0x12   :  { %p2731_p7 = pnand %p2730_p6, %p2724_p3 }
  0x14   :  { %2734 = shalt.err (!%p2731_p7)
}
  0x15   :  { %s2947_s21 = smov 128   ;;  %s2948_s22 = smov 8  }
  0x16   :  { %43 = dma.hbm_to_vmem [thread:$0]  %s3419_s1, 256, %s38_s10, [#allocation8], %s2947_s21, %s2947_s21, %s2948_s22  }
  0x17   :  { %s2735_s27 = scalar_lea.hbm %s3421_s3, 16 }
  0x18   :  { %p2736_p8 = scmp.ne.s32.totalorder %s3421_s3, %s2735_s27  ;;  %p2739_p9 = scmp.lt.u32.totalorder %s2735_s27, %s3421_s3 }
  0x1a   :  { %p2741_p10 = pnand %p2739_p9, %p2736_p8 }
  0x1c   :  { %2744 = shalt.err (!%p2741_p10)
}
  0x1d   :  { %s2745_s13 = scalar_lea.vmem %s3015_s12, 16  ;;  %s2749_s1 = scalar_lea.vmem %s3015_s12, 32 }
  0x1e   :  { %p2746_p11 = scmp.ne.s32.totalorder %s3015_s12, %s2745_s13  ;;  %p2750_p12 = scmp.lt.s32.totalorder %s3015_s12, %s3015_s12 }
  0x1f   :  { %p2751_p13 = scmp.lt.s32.totalorder %s2749_s1, %s2745_s13 }
  0x21   :  { %p2752_p0 = por %p2751_p13, %p2750_p12 }
  0x23   :  { %p2753_p1 = pnand %p2752_p0, %p2746_p11 }
  0x25   :  { %2756 = shalt.err (!%p2753_p1)
}
  0x26   :  { %65 = dma.hbm_to_vmem [thread:$0]  %s3421_s3, 16, %s3015_s12, [#allocation11]  }
  0x27   :  { %s2949_s15 = smov [#allocation13]   ;;  %s2950_s17 = smov [#allocation16]  }
  0x28   :  { %s83_s16 = sshll.u32 %s2949_s15, 4  ;;  %s105_s18 = sshll.u32 %s2950_s17, 4  ;;  %s84_s16 = int_to_ptr.vmem [resolvable:$true] %s83_s16  ;;  %s3050_s18 = int_to_ptr.vmem [resolvable:$true] %s105_s18 }
  0x29   :  { %s2757_s23 = scalar_lea.hbm %s3423_s5, 256 }
  0x2a   :  { %p2758_p2 = scmp.ne.s32.totalorder %s3423_s5, %s2757_s23  ;;  %p2761_p3 = scmp.lt.u32.totalorder %s2757_s23, %s3423_s5 }
  0x2c   :  { %p2763_p4 = pnand %p2761_p3, %p2758_p2 }
  0x2e   :  { %2766 = shalt.err (!%p2763_p4)
}
  0x2f   :  { %s2767_s3 = scalar_lea.vmem %s84_s16, 256  ;;  %p2772_p6 = scmp.lt.s32.totalorder %s84_s16, %s84_s16 }
  0x30   :  { %p2768_p5 = scmp.ne.s32.totalorder %s84_s16, %s2767_s3  ;;  %p2773_p7 = scmp.lt.s32.totalorder %s2767_s3, %s2767_s3 }
  0x32   :  { %p2774_p8 = por %p2773_p7, %p2772_p6 }
  0x34   :  { %p2775_p9 = pnand %p2774_p8, %p2768_p5 }
  0x36   :  { %2778 = shalt.err (!%p2775_p9)
}
  0x37   :  { %89 = dma.hbm_to_vmem [thread:$0]  %s3423_s5, 256, %s84_s16, [#allocation14], %s2947_s21, %s2947_s21, %s2948_s22  }
  0x38   :  { %s2779_s11 = scalar_lea.hbm %s3425_s7, 768 }
  0x39   :  { %p2780_p10 = scmp.ne.s32.totalorder %s3425_s7, %s2779_s11  ;;  %p2783_p11 = scmp.lt.u32.totalorder %s2779_s11, %s3425_s7 }
  0x3b   :  { %p2785_p12 = pnand %p2783_p11, %p2780_p10 }
  0x3d   :  { %2788 = shalt.err (!%p2785_p12)
}
  0x3e   :  { %s2789_s15 = scalar_lea.vmem %s3050_s18, 768  ;;  %p2794_p0 = scmp.lt.s32.totalorder %s3050_s18, %s3050_s18 }
  0x3f   :  { %p2790_p13 = scmp.ne.s32.totalorder %s3050_s18, %s2789_s15  ;;  %p2795_p1 = scmp.lt.s32.totalorder %s2789_s15, %s2789_s15 }
  0x41   :  { %p2796_p2 = por %p2795_p1, %p2794_p0 }
  0x43   :  { %p2797_p3 = pnand %p2796_p2, %p2790_p13 }
  0x45   :  { %2800 = shalt.err (!%p2797_p3)
}
  0x46   :  { %111 = dma.hbm_to_vmem [thread:$0]  %s3425_s7, 768, %s3050_s18, [#allocation17], %s2947_s21, %s2947_s21, %s2948_s22  }
  0x47   :  { %s2951_s17 = smov [#allocation4]   ;;  %s2952_s20 = smov [#allocation9]  }
  0x48   :  { %s25_s19 = sshll.u32 %s2951_s17, 4  ;;  %s49_s23 = sshll.u32 %s2952_s20, 4  ;;  %s26_s19 = int_to_ptr.vmem [resolvable:$true] %s25_s19  ;;  %s3087_s23 = int_to_ptr.vmem [resolvable:$true] %s49_s23 }
  0x49   :  { %s2801_s26 = scalar_lea.hbm %s3418_s0, 1024 }
  0x4a   :  { %p2802_p4 = scmp.ne.s32.totalorder %s3418_s0, %s2801_s26  ;;  %p2805_p5 = scmp.lt.u32.totalorder %s2801_s26, %s3418_s0 }
  0x4c   :  { %p2807_p6 = pnand %p2805_p5, %p2802_p4 }
  0x4e   :  { %2810 = shalt.err (!%p2807_p6)
}
  0x4f   :  { %s2811_s7 = scalar_lea.vmem %s26_s19, 1024  ;;  %p2816_p8 = scmp.lt.s32.totalorder %s26_s19, %s26_s19 }
  0x50   :  { %p2812_p7 = scmp.ne.s32.totalorder %s26_s19, %s2811_s7  ;;  %p2817_p9 = scmp.lt.s32.totalorder %s2811_s7, %s2811_s7 }
  0x52   :  { %p2818_p10 = por %p2817_p9, %p2816_p8 }
  0x54   :  { %p2819_p11 = pnand %p2818_p10, %p2812_p7 }
  0x56   :  { %2822 = shalt.err (!%p2819_p11)
}
  0x57   :  { %31 = dma.hbm_to_vmem [thread:$0]  %s3418_s0, 1024, %s26_s19, [#allocation5], %s2947_s21, %s2947_s21, %s2948_s22  }
  0x58   :  { %s2823_s13 = scalar_lea.hbm %s3420_s2, 256 }
  0x59   :  { %p2824_p12 = scmp.ne.s32.totalorder %s3420_s2, %s2823_s13  ;;  %p2827_p13 = scmp.lt.u32.totalorder %s2823_s13, %s3420_s2 }
  0x5b   :  { %p2829_p0 = pnand %p2827_p13, %p2824_p12 }
  0x5d   :  { %2832 = shalt.err (!%p2829_p0)
}
  0x5e   :  { %s2833_s5 = scalar_lea.vmem %s3087_s23, 256  ;;  %p2838_p2 = scmp.lt.s32.totalorder %s3087_s23, %s3087_s23 }
  0x5f   :  { %p2834_p1 = scmp.ne.s32.totalorder %s3087_s23, %s2833_s5  ;;  %p2839_p3 = scmp.lt.s32.totalorder %s2833_s5, %s2833_s5 }
  0x61   :  { %p2840_p4 = por %p2839_p3, %p2838_p2 }
  0x63   :  { %p2841_p5 = pnand %p2840_p4, %p2834_p1 }
  0x65   :  { %2844 = shalt.err (!%p2841_p5)
}
  0x66   :  { %55 = dma.hbm_to_vmem [thread:$0]  %s3420_s2, 256, %s3087_s23, [#allocation8], %s2947_s21, %s2947_s21, %s2948_s22  }
  0x67   :  { %s2953_s17 = smov [#allocation12]   ;;  %s2954_s20 = smov [#allocation15]  }
  0x68   :  { %s71_s19 = sshll.u32 %s2953_s17, 4  ;;  %s96_s24 = sshll.u32 %s2954_s20, 4  ;;  %s72_s19 = int_to_ptr.vmem [resolvable:$true] %s71_s19  ;;  %s97_s24 = int_to_ptr.vmem [resolvable:$true] %s96_s24 }
  0x69   :  { %s2845_s27 = scalar_lea.hbm %s3422_s4, 256 }
  0x6a   :  { %p2846_p6 = scmp.ne.s32.totalorder %s3422_s4, %s2845_s27  ;;  %p2849_p7 = scmp.lt.u32.totalorder %s2845_s27, %s3422_s4 }
  0x6c   :  { %p2851_p8 = pnand %p2849_p7, %p2846_p6 }
  0x6e   :  { %2854 = shalt.err (!%p2851_p8)
}
  0x6f   :  { %s2855_s2 = scalar_lea.vmem %s72_s19, 256  ;;  %p2860_p10 = scmp.lt.s32.totalorder %s72_s19, %s72_s19 }
  0x70   :  { %p2856_p9 = scmp.ne.s32.totalorder %s72_s19, %s2855_s2  ;;  %p2861_p11 = scmp.lt.s32.totalorder %s2855_s2, %s2855_s2 }
  0x72   :  { %p2862_p12 = por %p2861_p11, %p2860_p10 }
  0x74   :  { %p2863_p13 = pnand %p2862_p12, %p2856_p9 }
  0x76   :  { %2866 = shalt.err (!%p2863_p13)
}
  0x77   :  { %77 = dma.hbm_to_vmem [thread:$0]  %s3422_s4, 256, %s72_s19, [#allocation11], %s2947_s21, %s2947_s21, %s2948_s22  }
  0x78   :  { %s2867_s11 = scalar_lea.hbm %s3424_s6, 16 }
  0x79   :  { %p2868_p0 = scmp.ne.s32.totalorder %s3424_s6, %s2867_s11  ;;  %p2871_p1 = scmp.lt.u32.totalorder %s2867_s11, %s3424_s6 }
  0x7b   :  { %p2873_p2 = pnand %p2871_p1, %p2868_p0 }
  0x7d   :  { %2876 = shalt.err (!%p2873_p2)
}
  0x7e   :  { %s2877_s15 = scalar_lea.vmem %s97_s24, 16  ;;  %s2881_s5 = scalar_lea.vmem %s97_s24, 32 }
  0x7f   :  { %p2878_p3 = scmp.ne.s32.totalorder %s97_s24, %s2877_s15  ;;  %p2882_p4 = scmp.lt.s32.totalorder %s97_s24, %s97_s24 }
  0x80   :  { %p2883_p5 = scmp.lt.s32.totalorder %s2881_s5, %s2877_s15 }
  0x82   :  { %p2884_p6 = por %p2883_p5, %p2882_p4 }
  0x84   :  { %p2885_p7 = pnand %p2884_p6, %p2878_p3 }
  0x86   :  { %2888 = shalt.err (!%p2885_p7)
}
  0x87   :  { %99 = dma.hbm_to_vmem [thread:$0]  %s3424_s6, 16, %s97_s24, [#allocation14]  }
  0x88   :  { %s2955_s22 = smov [#allocation18]   ;;  %s2889_s19 = scalar_lea.hbm %s3426_s8, 16 }
  0x89   :  { %s118_s0 = sshll.u32 %s2955_s22, 4  ;;  %p2890_p8 = scmp.ne.s32.totalorder %s3426_s8, %s2889_s19  ;;  %s119_s0 = int_to_ptr.vmem [resolvable:$true] %s118_s0 }
  0x8a   :  { %p2893_p9 = scmp.lt.u32.totalorder %s2889_s19, %s3426_s8 }
  0x8c   :  { %p2895_p10 = pnand %p2893_p9, %p2890_p8 }
  0x8e   :  { %2898 = shalt.err (!%p2895_p10)
}
  0x8f   :  { %s2899_s3 = scalar_lea.vmem %s119_s0, 16  ;;  %s2903_s6 = scalar_lea.vmem %s119_s0, 32 }
  0x90   :  { %p2900_p11 = scmp.ne.s32.totalorder %s119_s0, %s2899_s3  ;;  %p2904_p12 = scmp.lt.s32.totalorder %s119_s0, %s119_s0 }
  0x91   :  { %p2905_p13 = scmp.lt.s32.totalorder %s2903_s6, %s2899_s3 }
  0x93   :  { %p2906_p0 = por %p2905_p13, %p2904_p12 }
  0x95   :  { %p2907_p1 = pnand %p2906_p0, %p2900_p11 }
  0x97   :  { %2910 = shalt.err (!%p2907_p1)
}
  0x98   :  { %121 = dma.hbm_to_vmem [thread:$0]  %s3426_s8, 16, %s119_s0, [#allocation17]  }
  0x99   :  { %2933 = dma.done.wait [#allocation5], 1024  }
  0x9a   :  { %2934 = vsyncadd [#allocation5], 4294966272 }
  0x9b   :  { %2935 = dma.done.wait [#allocation8], 512  }
  0x9c   :  { %2936 = vsyncadd [#allocation8], 4294966784 }
  0x9d   :  { %2937 = dma.done.wait [#allocation11], 272  }
  0x9e   :  { %2938 = vsyncadd [#allocation11], 4294967024 }
  0x9f   :  { %2939 = dma.done.wait [#allocation14], 272  }
  0xa0   :  { %2940 = vsyncadd [#allocation14], 4294967024 }
  0xa1   :  { %2941 = dma.done.wait [#allocation17], 784  }
  0xa2   :  { %2942 = vsyncadd [#allocation17], 4294966512  ;;  %vm166_vm0 = vcmask 130048   ;;  %v157_v0 = vld [vmem:[#allocation7] sm:$0xff]  ;;  %v158_v1 = vld [vmem:[#allocation7 + $0x8] sm:$0xff]  ;;  %v2956_v13 = vmov 0.0|0.0  }
  0xa3   :  { %v149_v2 = vld [vmem:[#allocation4] sm:$0xff]  ;;  %v2494_v3 = vpack.c.bf16 %v158_v1, %v157_v0  ;;  %v155_v4 = vld [vmem:[#allocation4 + $0x30] sm:$0xff]  ;;  %v150_v7 = vld [vmem:[#allocation4 + $0x8] sm:$0xff]  ;;  %vm2957_vm1 = vmmov 0   ;;  %v2958_v21 = vmov 0.0   ;;  %vm296_vm2 = vcmask 523264  }
  0xa4   :  { %2339 = vmatprep.mubr.msk.f32.mxu0 %vm166_vm0, %v149_v2  ;;  %2348 = vmatprep.mubr.msk.f32.mxu1 %vm166_vm0, %v155_v4  ;;  %v305_v5 = vld [vmem:[#allocation12] sm:$0xff]  ;;  %v306_v6 = vld [vmem:[#allocation12 + $0x8] sm:$0xff]  ;;  %v156_v9 = vld [vmem:[#allocation4 + $0x38] sm:$0xff]  ;;  %s2959_s8 = smov 96   ;;  %s2960_s28 = smov 16   ;;  %vm2100_vm3 = vcmask 261120  }
  0xa5   :  { %2495 = vmatprep.subr.bf16.mxu0 %v2494_v3  ;;  %2559 = vmatprep.subr.bf16.mxu1 %v2494_v3  ;;  %v2498_v8 = vpack.c.bf16 %v306_v6, %v305_v5  ;;  %v427_v10 = vld [vmem:[#allocation9] sm:$0xff]  ;;  %v428_v11 = vld [vmem:[#allocation9 + $0x8] sm:$0xff]  ;;  %v153_v18 = vld [vmem:[#allocation4 + $0x20] sm:$0xff]  ;;  %s2961_s7 = smov 32   ;;  %s2962_s2 = smov 80   ;;  %vm2116_vm4 = vcmask 392192  }
  0xa6   :  { %2497 = vmatpush3.bf16.msra.mxu0 %v2494_v3  ;;  %2560 = vmatpush3.bf16.msra.mxu1 %v2494_v3  ;;  %v151_v12 = vld [vmem:[#allocation4 + $0x10] sm:$0xff]  ;;  %v3166_v14 = vpack.c.bf16 %v428_v11, %v427_v10  ;;  %v430_v16 = vld [vmem:[#allocation13 + $0x8] sm:$0xff]  ;;  %v154_v20 = vld [vmem:[#allocation4 + $0x28] sm:$0xff]  ;;  %s2963_s23 = smov 112   ;;  %s2964_s18 = smov [#allocation19]  }
  0xa7   :  { %2499 = vmatprep.subr.bf16.mxu1 %v2498_v8  ;;  %2502 = vmatprep.subr.bf16.mxu0 %v2956_v13  ;;  %v429_v15 = vld [vmem:[#allocation13] sm:$0xff]  ;;  %v2210_v22 = vld [vmem:[#allocation10] ss:$0 sm:$0xff]  ;;  %v2219_v31 = vld [vmem:[#allocation15] ss:$0 sm:$0xff]  ;;  %s2197_s29 = sshll.u32 %s2964_s18, 4  ;;  %s2198_s29 = int_to_ptr.vmem [resolvable:$true] %s2197_s29 }
  0xa8   :  { %v152_v17 = vld [vmem:[#allocation4 + $0x18] sm:$0xff]  ;;  %v3173_v19 = vpack.c.bf16 %v430_v16, %v429_v15  ;;  %s2911_s30 = scalar_lea.vmem %s2198_s29, 128  ;;  %p2916_p3 = scmp.lt.s32.totalorder %s2198_s29, %s2198_s29 }
  0xa9   :  { %2340 = vmatmul.mubr.msk.f32.vlgmr.msra.gmra.mrb[0].mxu0 %vm166_vm0, %v150_v7  ;;  %2349 = vmatmul.mubr.msk.f32.vlgmr.msra.gmra.mrb[0].mxu1 %vm166_vm0, %v156_v9  ;;  %p2912_p2 = scmp.ne.s32.totalorder %s2198_s29, %s2911_s30  ;;  %p2917_p4 = scmp.lt.s32.totalorder %s2911_s30, %s2911_s30 }
  0xaa   :  { %2501 = vmatpush3.bf16.msra.mxu1 %v2498_v8  ;;  %2342 = vmatprep.mubr.msk.f32.mxu0 %vm166_vm0, %v151_v12 }
  0xab   :  { %2355 = vmatprep.mubr.msk.f32.mxu1 %vm166_vm0, %v149_v2  ;;  %2504 = vmatpush3.bf16.msra.mxu0 %v3166_v14  ;;  %p2918_p5 = por %p2917_p4, %p2916_p3 }
  0xac   :  { %2505 = vmatprep.subr.bf16.mxu1 %v2956_v13  ;;  %2508 = vmatprep.subr.bf16.mxu0 %v2956_v13 }
  0xad   :  { %2343 = vmatmul.mubr.msk.f32.gmra.mrb[2].mxu0 %vm166_vm0, %v152_v17  ;;  %2356 = vmatmul.mubr.msk.f32.vlgmr.msra.gmra.mrb[2].mxu1 %vm166_vm0, %v150_v7  ;;  %p2919_p6 = pnand %p2918_p5, %p2912_p2 }
  0xae   :  { %2345 = vmatprep.mubr.msk.f32.mxu0 %vm166_vm0, %v153_v18  ;;  %2358 = vmatprep.mubr.msk.f32.mxu1 %vm166_vm0, %v151_v12 }
  0xaf   :  { %2507 = vmatpush3.bf16.msra.mxu1 %v3173_v19 }
  0xb0   :  { %2511 = vmatprep.subr.bf16.mxu1 %v2956_v13 }
  0xb1   :  { %2346 = vmatmul.mubr.msk.f32.gmra.mrb[4].mxu0 %vm166_vm0, %v154_v20  ;;  %2359 = vmatmul.mubr.msk.f32.gmra.mrb[4].mxu1 %vm166_vm0, %v152_v17 }
  0xb2   :  { %2361 = vmatprep.mubr.msk.f32.mxu1 %vm166_vm0, %v153_v18  ;;  %2371 = vmatprep.mubr.msk.f32.mxu0 %vm2957_vm1, %v2958_v21 }
  0xb5   :  { %2362 = vmatmul.mubr.msk.f32.gmra.mrb[6].mxu1 %vm166_vm0, %v154_v20  ;;  %2372 = vmatmul.mubr.f32.vlgmr.msra.gmra.mrb[6].mxu0 %v2958_v21 }
  0xb6   :  { %2364 = vmatprep.mubr.msk.f32.mxu1 %vm166_vm0, %v155_v4  ;;  %2510 = vmatpush3.bf16.msra.mxu0 %v3166_v14 }
  0xb7   :  { %2385 = vmatprep.mubr.msk.f32.mxu0 %vm2957_vm1, %v2958_v21  ;;  %2514 = vmatprep.subr.bf16.mxu0 %v2956_v13 }
  0xb9   :  { %2365 = vmatmul.mubr.msk.f32.gmra.mrb[8].mxu1 %vm166_vm0, %v156_v9 }
  0xba   :  { %2378 = vmatprep.mubr.msk.f32.mxu1 %vm2957_vm1, %v2958_v21 }
  0xbd   :  { %2379 = vmatmul.mubr.f32.vlgmr.msra.gmra.mrb[10].mxu1 %v2958_v21 }
  0xbe   :  { %2513 = vmatpush3.bf16.msra.mxu1 %v3173_v19  ;;  %2392 = vmatprep.mubr.msk.f32.mxu1 %vm2957_vm1, %v2958_v21 }
  0xbf   :  { %2517 = vmatprep.subr.bf16.mxu1 %v2956_v13 }
 0x17c   :  { %v2350_v23 = vpop.f32.mrb[0].mxu1  ;;  %v2341_v24 = vpop.f32.mrb[0].mxu0 }
 0x17d   :  { %v293_v25 = vadd.f32 %v2350_v23, %v2210_v22  ;;  %v263_v26 = vadd.f32 %v2341_v24, %v2210_v22  ;;  %v287_v27 = vpop.f32.mrb[1].mxu1  ;;  %v257_v28 = vpop.f32.mrb[1].mxu0 }
 0x17e   :  { %v288_v29 = vadd.f32 %v2210_v22, %v287_v27  ;;  %v258_v30 = vadd.f32 %v2210_v22, %v257_v28 }
 0x17f   :  { %304 = vst.msk [vmem:[#allocation2 + $0x38] sm:$0xff] %vm296_vm2, %v293_v25  ;;  %298 = vst.msk [vmem:[#allocation2 + $0x8] sm:$0xff] %vm296_vm2, %v263_v26 }
 0x180   :  { %303 = vst.msk [vmem:[#allocation2 + $0x30] sm:$0xff] %vm296_vm2, %v288_v29  ;;  %297 = vst.msk [vmem:[#allocation2] sm:$0xff] %vm296_vm2, %v258_v30  ;;  %v2357_v32 = vpop.f32.mrb[2].mxu1  ;;  %v2344_v33 = vpop.f32.mrb[2].mxu0 }
 0x181   :  { %v386_v34 = vadd.f32 %v2357_v32, %v2219_v31  ;;  %v380_v35 = vpop.f32.mrb[3].mxu1  ;;  %v273_v36 = vadd.f32 %v2344_v33, %v2210_v22  ;;  %v267_v37 = vpop.f32.mrb[3].mxu0 }
 0x182   :  { %v381_v38 = vadd.f32 %v2219_v31, %v380_v35  ;;  %v268_v39 = vadd.f32 %v2210_v22, %v267_v37 }
 0x183   :  { %420 = vst.msk [vmem:[#allocation3 + $0x8] sm:$0xff] %vm296_vm2, %v386_v34  ;;  %300 = vst.msk [vmem:[#allocation2 + $0x18] sm:$0xff] %vm296_vm2, %v273_v36 }
 0x184   :  { %419 = vst.msk [vmem:[#allocation3] sm:$0xff] %vm296_vm2, %v381_v38  ;;  %v2360_v40 = vpop.f32.mrb[4].mxu1  ;;  %299 = vst.msk [vmem:[#allocation2 + $0x10] sm:$0xff] %vm296_vm2, %v268_v39  ;;  %v2347_v41 = vpop.f32.mrb[4].mxu0 }
 0x185   :  { %v396_v42 = vadd.f32 %v2360_v40, %v2219_v31  ;;  %v390_v43 = vpop.f32.mrb[5].mxu1  ;;  %v283_v44 = vadd.f32 %v2347_v41, %v2210_v22  ;;  %v277_v45 = vpop.f32.mrb[5].mxu0 }
 0x186   :  { %v391_v46 = vadd.f32 %v2219_v31, %v390_v43  ;;  %v278_v47 = vadd.f32 %v2210_v22, %v277_v45  ;;  %v628_v32 = vld [vmem:[#allocation2 + $0x8] sm:$0xff] }
 0x187   :  { %422 = vst.msk [vmem:[#allocation3 + $0x18] sm:$0xff] %vm296_vm2, %v396_v42  ;;  %302 = vst.msk [vmem:[#allocation2 + $0x28] sm:$0xff] %vm296_vm2, %v283_v44  ;;  %v431_v48 = vld [vmem:[#allocation2] sm:$0xff] }
 0x188   :  { %421 = vst.msk [vmem:[#allocation3 + $0x10] sm:$0xff] %vm296_vm2, %v391_v46  ;;  %301 = vst.msk [vmem:[#allocation2 + $0x20] sm:$0xff] %vm296_vm2, %v278_v47  ;;  %v2363_v49 = vpop.f32.mrb[6].mxu1  ;;  %v501_v50 = vpop.f32.mrb[6].mxu0 }
 0x189   :  { %v406_v51 = vadd.f32 %v2363_v49, %v2219_v31  ;;  %v505_v52 = vadd.f32 %v501_v50, %v431_v48  ;;  %v400_v53 = vpop.f32.mrb[7].mxu1  ;;  %v2373_v54 = vpop.f32.mrb[7].mxu0 }
 0x18a   :  { %v401_v55 = vadd.f32 %v2219_v31, %v400_v53 }
 0x18b   :  { %424 = vst.msk [vmem:[#allocation3 + $0x28] sm:$0xff] %vm296_vm2, %v406_v51  ;;  %2581 = vtanh.f32 %v505_v52  ;;  %v2228_v2 = vmul.f32 -1.442695, %v505_v52 }
 0x18c   :  { %423 = vst.msk [vmem:[#allocation3 + $0x20] sm:$0xff] %vm296_vm2, %v401_v55  ;;  %v2366_v56 = vpop.f32.mrb[8].mxu1 }
 0x18d   :  { %v416_v57 = vadd.f32 %v2366_v56, %v2219_v31  ;;  %v410_v58 = vpop.f32.mrb[9].mxu1 }
 0x18e   :  { %v411_v59 = vadd.f32 %v2219_v31, %v410_v58 }
 0x18f   :  { %426 = vst.msk [vmem:[#allocation3 + $0x38] sm:$0xff] %vm296_vm2, %v416_v57 }
 0x190   :  { %425 = vst.msk [vmem:[#allocation3 + $0x30] sm:$0xff] %vm296_vm2, %v411_v59  ;;  %v598_v60 = vpop.f32.mrb[10].mxu1 }
 0x191   :  { %v2380_v61 = vpop.f32.mrb[11].mxu1 }
 0x195   :  { %v2582_v62 = vpop.eup %2581 }
 0x196   :  { %v531_v63 = vld [vmem:[#allocation3 + $0x38] sm:$0xff]  ;;  %515 = vrot.lane.b32.xlu0 %v2582_v62, %s2959_s8 }
 0x197   :  { %v602_v0 = vadd.f32 %v598_v60, %v531_v63  ;;  %v730_v37 = vld [vmem:[#allocation3 + $0x30] sm:$0xff] }
 0x199   :  { %2583 = vtanh.f32 %v602_v0  ;;  %v2229_v4 = vmul.f32 -1.442695, %v602_v0 }
 0x19a   :  { %2585 = vpow2.f32 %v2228_v2 }
 0x19b   :  { %2587 = vpow2.f32 %v2229_v4  ;;  %v834_v4 = vld [vmem:[#allocation2 + $0x10] sm:$0xff] }
 0x1a3   :  { %v2584_v1 = vpop.eup %2583 }
 0x1a4   :  { %612 = vrot.lane.b32.xlu0 %v2584_v1, %s2959_s8  ;;  %v2586_v3 = vpop.eup %2585 }
 0x1a5   :  { %v509_v5 = vadd.f32 1.0, %v2586_v3  ;;  %v2588_v6 = vpop.eup %2587 }
 0x1a6   :  { %v606_v8 = vadd.f32 1.0, %v2588_v6 }
 0x1a7   :  { %2589 = vrcp.f32 %v509_v5 }
 0x1a8   :  { %2591 = vrcp.f32 %v606_v8 }
 0x1b1   :  { %v2590_v7 = vpop.eup %2589 }
 0x1b2   :  { %v2592_v11 = vpop.eup %2591  ;;  %v513_v16 = vmul.f32 0.0, %v2590_v7 }
 0x1b3   :  { %v610_v22 = vmul.f32 0.0, %v2592_v11 }
 0x208   :  { %v516_v9 = vpop.permute.xlu0 %515 }
 0x209   :  { %v518_v10 = vmul.f32 %v2590_v7, %v516_v9  ;;  %v936_v9 = vld [vmem:[#allocation3 + $0x28] sm:$0xff] }
 0x20b   :  { %520 = vrot.lane.b32.xlu1 %v518_v10, %s2960_s28 }
 0x216   :  { %v613_v12 = vpop.permute.xlu0 %612 }
 0x217   :  { %v615_v15 = vmul.f32 %v2592_v11, %v613_v12 }
 0x219   :  { %617 = vrot.lane.b32.xlu1 %v615_v15, %s2960_s28 }
 0x27d   :  { %v521_v17 = vpop.permute.xlu1 %520 }
 0x27e   :  { %v523_v18 = vadd.f32 %v521_v17, %v513_v16 }
 0x280   :  { %2593 = vtanh.f32 %v523_v18 }
 0x28a   :  { %v2594_v20 = vpop.eup %2593 }
 0x28b   :  { %v618_v23 = vpop.permute.xlu1 %617  ;;  %526 = vrot.lane.b32.xlu0 %v2594_v20, %s2961_s7 }
 0x28c   :  { %v620_v24 = vadd.f32 %v618_v23, %v610_v22 }
 0x28e   :  { %2595 = vtanh.f32 %v620_v24 }
 0x298   :  { %v2596_v25 = vpop.eup %2595 }
 0x299   :  { %623 = vrot.lane.b32.xlu1 %v2596_v25, %s2961_s7 }
 0x2fd   :  { %v527_v26 = vpop.permute.xlu0 %526 }
 0x2fe   :  { %v3225_v27 = vmul.f32 %v2590_v7, %v527_v26 }
 0x300   :  { %630 = vrot.lane.b32.xlu0 %v3225_v27, %s2962_s2 }
 0x30b   :  { %v624_v28 = vpop.permute.xlu1 %623 }
 0x30c   :  { %v3229_v29 = vmul.f32 %v2592_v11, %v624_v28 }
 0x30e   :  { %732 = vrot.lane.b32.xlu1 %v3229_v29, %s2962_s2 }
 0x372   :  { %v631_v30 = vpop.permute.xlu0 %630 }
 0x373   :  { %2386 = vmatmul.mubr.msk.f32.vlgmr.msra.gmra.mrb[8].mxu0 %vm166_vm0, %v631_v30 }
 0x374   :  { %2516 = vmatpush3.bf16.msra.mxu0 %v3166_v14  ;;  %2399 = vmatprep.mubr.msk.f32.mxu0 %vm2957_vm1, %v2958_v21 }
 0x375   :  { %2520 = vmatprep.subr.bf16.mxu0 %v2956_v13 }
 0x380   :  { %v733_v31 = vpop.permute.xlu1 %732 }
 0x381   :  { %2393 = vmatmul.mubr.msk.f32.vlgmr.msra.gmra.mrb[12].mxu1 %vm166_vm0, %v733_v31 }
 0x382   :  { %2519 = vmatpush3.bf16.msra.mxu1 %v3173_v19  ;;  %2406 = vmatprep.mubr.msk.f32.mxu1 %vm2957_vm1, %v2958_v21 }
 0x383   :  { %2523 = vmatprep.subr.bf16.mxu1 %v2956_v13 }
 0x446   :  { %v700_v33 = vpop.f32.mrb[8].mxu0 }
 0x447   :  { %v704_v34 = vadd.f32 %v700_v33, %v628_v32  ;;  %v2387_v35 = vpop.f32.mrb[9].mxu0 }
 0x449   :  { %2597 = vtanh.f32 %v704_v34  ;;  %v2231_v42 = vmul.f32 -1.442695, %v704_v34 }
 0x453   :  { %v2598_v36 = vpop.eup %2597 }
 0x454   :  { %v802_v38 = vpop.f32.mrb[12].mxu1  ;;  %714 = vrot.lane.b32.xlu0 %v2598_v36, %s2959_s8 }
 0x455   :  { %v806_v39 = vadd.f32 %v802_v38, %v730_v37  ;;  %v2394_v40 = vpop.f32.mrb[13].mxu1 }
 0x457   :  { %2599 = vtanh.f32 %v806_v39  ;;  %v2233_v44 = vmul.f32 -1.442695, %v806_v39 }
 0x458   :  { %2601 = vpow2.f32 %v2231_v42 }
 0x459   :  { %2603 = vpow2.f32 %v2233_v44 }
 0x461   :  { %v2600_v41 = vpop.eup %2599 }
 0x462   :  { %816 = vrot.lane.b32.xlu1 %v2600_v41, %s2959_s8  ;;  %v2602_v43 = vpop.eup %2601 }
 0x463   :  { %v708_v45 = vadd.f32 1.0, %v2602_v43  ;;  %v2604_v46 = vpop.eup %2603 }
 0x464   :  { %v810_v48 = vadd.f32 1.0, %v2604_v46 }
 0x465   :  { %2605 = vrcp.f32 %v708_v45 }
 0x466   :  { %2607 = vrcp.f32 %v810_v48 }
 0x46f   :  { %v2606_v47 = vpop.eup %2605 }
 0x470   :  { %v2608_v51 = vpop.eup %2607  ;;  %v712_v54 = vmul.f32 %v2606_v47, %v523_v18 }
 0x471   :  { %v814_v58 = vmul.f32 %v2608_v51, %v620_v24 }
 0x4c6   :  { %v715_v49 = vpop.permute.xlu0 %714 }
 0x4c7   :  { %v717_v50 = vmul.f32 %v2606_v47, %v715_v49 }
 0x4c9   :  { %719 = vrot.lane.b32.xlu0 %v717_v50, %s2960_s28 }
 0x4d4   :  { %v817_v52 = vpop.permute.xlu1 %816 }
 0x4d5   :  { %v819_v53 = vmul.f32 %v2608_v51, %v817_v52 }
 0x4d7   :  { %821 = vrot.lane.b32.xlu1 %v819_v53, %s2960_s28  ;;  %v1142_v53 = vld [vmem:[#allocation3 + $0x20] sm:$0xff] }
 0x53b   :  { %v720_v55 = vpop.permute.xlu0 %719 }
 0x53c   :  { %v722_v56 = vadd.f32 %v720_v55, %v712_v54 }
 0x53e   :  { %2609 = vtanh.f32 %v722_v56 }
 0x548   :  { %v2610_v57 = vpop.eup %2609 }
 0x549   :  { %v822_v59 = vpop.permute.xlu1 %821  ;;  %725 = vrot.lane.b32.xlu0 %v2610_v57, %s2961_s7 }
 0x54a   :  { %v824_v60 = vadd.f32 %v822_v59, %v814_v58 }
 0x54c   :  { %2611 = vtanh.f32 %v824_v60 }
 0x556   :  { %v2612_v61 = vpop.eup %2611 }
 0x557   :  { %827 = vrot.lane.b32.xlu1 %v2612_v61, %s2961_s7 }
 0x5bb   :  { %v726_v62 = vpop.permute.xlu0 %725 }
 0x5bc   :  { %v3249_v63 = vmul.f32 %v2606_v47, %v726_v62 }
 0x5be   :  { %836 = vrot.lane.b32.xlu0 %v3249_v63, %s2962_s2  ;;  %v831_v41 = vmax.f32 %v3225_v27, %v3249_v63 }
 0x5c9   :  { %v828_v0 = vpop.permute.xlu1 %827 }
 0x5ca   :  { %v3253_v1 = vmul.f32 %v2608_v51, %v828_v0 }
 0x5cc   :  { %938 = vrot.lane.b32.xlu1 %v3253_v1, %s2962_s2  ;;  %v832_v45 = vmax.f32 %v3229_v29, %v3253_v1  ;;  %v1040_v29 = vld [vmem:[#allocation2 + $0x18] sm:$0xff] }
 0x630   :  { %v837_v2 = vpop.permute.xlu0 %836 }
 0x631   :  { %2400 = vmatmul.mubr.msk.f32.vlgmr.msra.gmra.mrb[10].mxu0 %vm166_vm0, %v837_v2 }
 0x632   :  { %2522 = vmatpush3.bf16.msra.mxu0 %v3166_v14  ;;  %2413 = vmatprep.mubr.msk.f32.mxu0 %vm2957_vm1, %v2958_v21 }
 0x633   :  { %2526 = vmatprep.subr.bf16.mxu0 %v2956_v13 }
 0x63e   :  { %v939_v3 = vpop.permute.xlu1 %938 }
 0x63f   :  { %2407 = vmatmul.mubr.msk.f32.vlgmr.msra.gmra.mrb[14].mxu1 %vm166_vm0, %v939_v3 }
 0x640   :  { %2525 = vmatpush3.bf16.msra.mxu1 %v3173_v19  ;;  %2420 = vmatprep.mubr.msk.f32.mxu1 %vm2957_vm1, %v2958_v21 }
 0x641   :  { %2529 = vmatprep.subr.bf16.mxu1 %v2956_v13 }
 0x704   :  { %v906_v5 = vpop.f32.mrb[10].mxu0 }
 0x705   :  { %v910_v6 = vadd.f32 %v906_v5, %v834_v4  ;;  %v2401_v7 = vpop.f32.mrb[11].mxu0 }
 0x707   :  { %2613 = vtanh.f32 %v910_v6  ;;  %v2235_v16 = vmul.f32 -1.442695, %v910_v6 }
 0x711   :  { %v2614_v8 = vpop.eup %2613 }
 0x712   :  { %v1008_v10 = vpop.f32.mrb[14].mxu1  ;;  %920 = vrot.lane.b32.xlu0 %v2614_v8, %s2959_s8 }
 0x713   :  { %v1012_v11 = vadd.f32 %v1008_v10, %v936_v9  ;;  %v2408_v12 = vpop.f32.mrb[15].mxu1 }
 0x715   :  { %2615 = vtanh.f32 %v1012_v11  ;;  %v2237_v18 = vmul.f32 -1.442695, %v1012_v11 }
 0x716   :  { %2617 = vpow2.f32 %v2235_v16 }
 0x717   :  { %2619 = vpow2.f32 %v2237_v18 }
 0x71f   :  { %v2616_v15 = vpop.eup %2615 }
 0x720   :  { %1022 = vrot.lane.b32.xlu1 %v2616_v15, %s2959_s8  ;;  %v2618_v17 = vpop.eup %2617 }
 0x721   :  { %v914_v20 = vadd.f32 1.0, %v2618_v17  ;;  %v2620_v22 = vpop.eup %2619 }
 0x722   :  { %v1016_v24 = vadd.f32 1.0, %v2620_v22 }
 0x723   :  { %2621 = vrcp.f32 %v914_v20 }
 0x724   :  { %2623 = vrcp.f32 %v1016_v24 }
 0x72d   :  { %v2622_v23 = vpop.eup %2621 }
 0x72e   :  { %v2624_v28 = vpop.eup %2623  ;;  %v918_v32 = vmul.f32 %v2622_v23, %v722_v56 }
 0x72f   :  { %v1020_v36 = vmul.f32 %v2624_v28, %v824_v60 }
 0x784   :  { %v921_v25 = vpop.permute.xlu0 %920 }
 0x785   :  { %v923_v26 = vmul.f32 %v2622_v23, %v921_v25 }
 0x787   :  { %925 = vrot.lane.b32.xlu0 %v923_v26, %s2960_s28  ;;  %v1246_v26 = vld [vmem:[#allocation2 + $0x20] sm:$0xff] }
 0x792   :  { %v1023_v30 = vpop.permute.xlu1 %1022 }
 0x793   :  { %v1025_v31 = vmul.f32 %v2624_v28, %v1023_v30 }
 0x795   :  { %1027 = vrot.lane.b32.xlu1 %v1025_v31, %s2960_s28 }
 0x7f9   :  { %v926_v33 = vpop.permute.xlu0 %925 }
 0x7fa   :  { %v928_v34 = vadd.f32 %v926_v33, %v918_v32  ;;  %v1348_v33 = vld [vmem:[#allocation3 + $0x18] sm:$0xff] }
 0x7fc   :  { %2625 = vtanh.f32 %v928_v34 }
 0x806   :  { %v2626_v35 = vpop.eup %2625 }
 0x807   :  { %v1028_v37 = vpop.permute.xlu1 %1027  ;;  %931 = vrot.lane.b32.xlu0 %v2626_v35, %s2961_s7 }
 0x808   :  { %v1030_v38 = vadd.f32 %v1028_v37, %v1020_v36 }
 0x80a   :  { %2627 = vtanh.f32 %v1030_v38 }
 0x814   :  { %v2628_v39 = vpop.eup %2627 }
 0x815   :  { %1033 = vrot.lane.b32.xlu1 %v2628_v39, %s2961_s7 }
 0x879   :  { %v932_v40 = vpop.permute.xlu0 %931 }
 0x87a   :  { %v934_v42 = vmul.f32 %v2622_v23, %v932_v40 }
 0x87c   :  { %v3275_v43 = vmax.f32 %v831_v41, %v934_v42  ;;  %1042 = vrot.lane.b32.xlu0 %v934_v42, %s2962_s2 }
 0x887   :  { %v1034_v44 = vpop.permute.xlu1 %1033 }
 0x888   :  { %v1036_v46 = vmul.f32 %v2624_v28, %v1034_v44 }
 0x88a   :  { %v3280_v47 = vmax.f32 %v832_v45, %v1036_v46  ;;  %1144 = vrot.lane.b32.xlu1 %v1036_v46, %s2962_s2 }
 0x8ee   :  { %v1043_v48 = vpop.permute.xlu0 %1042 }
 0x8ef   :  { %2414 = vmatmul.mubr.msk.f32.vlgmr.msra.gmra.mrb[12].mxu0 %vm166_vm0, %v1043_v48 }
 0x8f0   :  { %2528 = vmatpush3.bf16.msra.mxu0 %v3166_v14  ;;  %2427 = vmatprep.mubr.msk.f32.mxu0 %vm2957_vm1, %v2958_v21 }
 0x8f1   :  { %2532 = vmatprep.subr.bf16.mxu0 %v2956_v13 }
 0x8fc   :  { %v1145_v27 = vpop.permute.xlu1 %1144 }
 0x8fd   :  { %2421 = vmatmul.mubr.msk.f32.vlgmr.msra.gmra.mrb[16].mxu1 %vm166_vm0, %v1145_v27 }
 0x8fe   :  { %2531 = vmatpush3.bf16.msra.mxu1 %v3173_v19  ;;  %2434 = vmatprep.mubr.msk.f32.mxu1 %vm2957_vm1, %v2958_v21 }
 0x8ff   :  { %2535 = vmatprep.subr.bf16.mxu1 %v2956_v13 }
 0x9c2   :  { %v1112_v49 = vpop.f32.mrb[12].mxu0 }
 0x9c3   :  { %v1116_v50 = vadd.f32 %v1112_v49, %v1040_v29  ;;  %v2415_v51 = vpop.f32.mrb[13].mxu0 }
 0x9c5   :  { %2629 = vtanh.f32 %v1116_v50  ;;  %v2239_v58 = vmul.f32 -1.442695, %v1116_v50 }
 0x9cf   :  { %v2630_v52 = vpop.eup %2629 }
 0x9d0   :  { %v1214_v54 = vpop.f32.mrb[16].mxu1  ;;  %1126 = vrot.lane.b32.xlu0 %v2630_v52, %s2959_s8 }
 0x9d1   :  { %v1218_v55 = vadd.f32 %v1214_v54, %v1142_v53  ;;  %v2422_v56 = vpop.f32.mrb[17].mxu1 }
 0x9d3   :  { %2631 = vtanh.f32 %v1218_v55  ;;  %v2241_v60 = vmul.f32 -1.442695, %v1218_v55 }
 0x9d4   :  { %2633 = vpow2.f32 %v2239_v58 }
 0x9d5   :  { %2635 = vpow2.f32 %v2241_v60 }
 0x9dd   :  { %v2632_v57 = vpop.eup %2631 }
 0x9de   :  { %1228 = vrot.lane.b32.xlu1 %v2632_v57, %s2959_s8  ;;  %v2634_v59 = vpop.eup %2633 }
 0x9df   :  { %v1120_v61 = vadd.f32 1.0, %v2634_v59  ;;  %v2636_v62 = vpop.eup %2635 }
 0x9e0   :  { %v1222_v0 = vadd.f32 1.0, %v2636_v62 }
 0x9e1   :  { %2637 = vrcp.f32 %v1120_v61 }
 0x9e2   :  { %2639 = vrcp.f32 %v1222_v0  ;;  %v1452_v0 = vld [vmem:[#allocation2 + $0x28] sm:$0xff] }
 0x9eb   :  { %v2638_v63 = vpop.eup %2637 }
 0x9ec   :  { %v2640_v3 = vpop.eup %2639  ;;  %v1124_v6 = vmul.f32 %v2638_v63, %v928_v34 }
 0x9ed   :  { %v1226_v10 = vmul.f32 %v2640_v3, %v1030_v38 }
 0xa42   :  { %v1127_v1 = vpop.permute.xlu0 %1126 }
 0xa43   :  { %v1129_v2 = vmul.f32 %v2638_v63, %v1127_v1 }
 0xa45   :  { %1131 = vrot.lane.b32.xlu0 %v1129_v2, %s2960_s28 }
 0xa50   :  { %v1229_v4 = vpop.permute.xlu1 %1228 }
 0xa51   :  { %v1231_v5 = vmul.f32 %v2640_v3, %v1229_v4 }
 0xa53   :  { %1233 = vrot.lane.b32.xlu1 %v1231_v5, %s2960_s28  ;;  %v1554_v5 = vld [vmem:[#allocation3 + $0x10] sm:$0xff] }
 0xab7   :  { %v1132_v7 = vpop.permute.xlu0 %1131 }
 0xab8   :  { %v1134_v8 = vadd.f32 %v1132_v7, %v1124_v6 }
 0xaba   :  { %2641 = vtanh.f32 %v1134_v8 }
 0xac4   :  { %v2642_v9 = vpop.eup %2641 }
 0xac5   :  { %v1234_v11 = vpop.permute.xlu1 %1233  ;;  %1137 = vrot.lane.b32.xlu0 %v2642_v9, %s2961_s7 }
 0xac6   :  { %v1236_v12 = vadd.f32 %v1234_v11, %v1226_v10 }
 0xac8   :  { %2643 = vtanh.f32 %v1236_v12 }
 0xad2   :  { %v2644_v15 = vpop.eup %2643 }
 0xad3   :  { %1239 = vrot.lane.b32.xlu1 %v2644_v15, %s2961_s7 }
 0xb37   :  { %v1138_v16 = vpop.permute.xlu0 %1137 }
 0xb38   :  { %v3299_v17 = vmul.f32 %v2638_v63, %v1138_v16 }
 0xb3a   :  { %v1243_v18 = vmax.f32 %v3275_v43, %v3299_v17  ;;  %1248 = vrot.lane.b32.xlu0 %v3299_v17, %s2962_s2 }
 0xb45   :  { %v1240_v20 = vpop.permute.xlu1 %1239 }
 0xb46   :  { %v3305_v22 = vmul.f32 %v2640_v3, %v1240_v20 }
 0xb48   :  { %v1244_v23 = vmax.f32 %v3280_v47, %v3305_v22  ;;  %1350 = vrot.lane.b32.xlu1 %v3305_v22, %s2962_s2 }
 0xbac   :  { %v1249_v24 = vpop.permute.xlu0 %1248 }
 0xbad   :  { %2428 = vmatmul.mubr.msk.f32.vlgmr.msra.gmra.mrb[14].mxu0 %vm166_vm0, %v1249_v24 }
 0xbae   :  { %2534 = vmatpush3.bf16.msra.mxu0 %v3166_v14  ;;  %2441 = vmatprep.mubr.msk.f32.mxu0 %vm2957_vm1, %v2958_v21 }
 0xbaf   :  { %2538 = vmatprep.subr.bf16.mxu0 %v2956_v13 }
 0xbba   :  { %v1351_v25 = vpop.permute.xlu1 %1350 }
 0xbbb   :  { %2435 = vmatmul.mubr.msk.f32.vlgmr.msra.gmra.mrb[18].mxu1 %vm166_vm0, %v1351_v25 }
 0xbbc   :  { %2537 = vmatpush3.bf16.msra.mxu1 %v3173_v19  ;;  %2448 = vmatprep.mubr.msk.f32.mxu1 %vm2957_vm1, %v2958_v21 }
 0xbbd   :  { %2541 = vmatprep.subr.bf16.mxu1 %v2956_v13 }
 0xc80   :  { %v1318_v28 = vpop.f32.mrb[14].mxu0 }
 0xc81   :  { %v1322_v30 = vadd.f32 %v1318_v28, %v1246_v26  ;;  %v2429_v31 = vpop.f32.mrb[15].mxu0 }
 0xc83   :  { %2645 = vtanh.f32 %v1322_v30  ;;  %v2243_v38 = vmul.f32 -1.442695, %v1322_v30 }
 0xc8d   :  { %v2646_v32 = vpop.eup %2645 }
 0xc8e   :  { %v1420_v34 = vpop.f32.mrb[18].mxu1  ;;  %1332 = vrot.lane.b32.xlu0 %v2646_v32, %s2959_s8 }
 0xc8f   :  { %v1424_v35 = vadd.f32 %v1420_v34, %v1348_v33  ;;  %v2436_v36 = vpop.f32.mrb[19].mxu1 }
 0xc91   :  { %2647 = vtanh.f32 %v1424_v35  ;;  %v2245_v40 = vmul.f32 -1.442695, %v1424_v35 }
 0xc92   :  { %2649 = vpow2.f32 %v2243_v38 }
 0xc93   :  { %2651 = vpow2.f32 %v2245_v40 }
 0xc9b   :  { %v2648_v37 = vpop.eup %2647 }
 0xc9c   :  { %1434 = vrot.lane.b32.xlu1 %v2648_v37, %s2959_s8  ;;  %v2650_v39 = vpop.eup %2649 }
 0xc9d   :  { %v1326_v41 = vadd.f32 1.0, %v2650_v39  ;;  %v2652_v42 = vpop.eup %2651 }
 0xc9e   :  { %v1428_v44 = vadd.f32 1.0, %v2652_v42 }
 0xc9f   :  { %2653 = vrcp.f32 %v1326_v41 }
 0xca0   :  { %2655 = vrcp.f32 %v1428_v44  ;;  %v1658_v44 = vld [vmem:[#allocation2 + $0x30] sm:$0xff] }
 0xca9   :  { %v2654_v43 = vpop.eup %2653 }
 0xcaa   :  { %v2656_v47 = vpop.eup %2655  ;;  %v1330_v29 = vmul.f32 %v2654_v43, %v1134_v8 }
 0xcab   :  { %v1432_v52 = vmul.f32 %v2656_v47, %v1236_v12 }
 0xd00   :  { %v1333_v45 = vpop.permute.xlu0 %1332 }
 0xd01   :  { %v1335_v46 = vmul.f32 %v2654_v43, %v1333_v45 }
 0xd03   :  { %1337 = vrot.lane.b32.xlu0 %v1335_v46, %s2960_s28 }
 0xd0e   :  { %v1435_v48 = vpop.permute.xlu1 %1434 }
 0xd0f   :  { %v1437_v27 = vmul.f32 %v2656_v47, %v1435_v48 }
 0xd11   :  { %1439 = vrot.lane.b32.xlu1 %v1437_v27, %s2960_s28 }
 0xd75   :  { %v1338_v49 = vpop.permute.xlu0 %1337 }
 0xd76   :  { %v1340_v50 = vadd.f32 %v1338_v49, %v1330_v29 }
 0xd78   :  { %2657 = vtanh.f32 %v1340_v50 }
 0xd82   :  { %v2658_v51 = vpop.eup %2657 }
 0xd83   :  { %v1440_v53 = vpop.permute.xlu1 %1439  ;;  %1343 = vrot.lane.b32.xlu0 %v2658_v51, %s2961_s7 }
 0xd84   :  { %v1442_v54 = vadd.f32 %v1440_v53, %v1432_v52 }
 0xd86   :  { %2659 = vtanh.f32 %v1442_v54 }
 0xd90   :  { %v2660_v55 = vpop.eup %2659 }
 0xd91   :  { %1445 = vrot.lane.b32.xlu1 %v2660_v55, %s2961_s7 }
 0xdf5   :  { %v1344_v56 = vpop.permute.xlu0 %1343 }
 0xdf6   :  { %v1346_v57 = vmul.f32 %v2654_v43, %v1344_v56 }
 0xdf8   :  { %v3327_v58 = vmax.f32 %v1243_v18, %v1346_v57  ;;  %1454 = vrot.lane.b32.xlu0 %v1346_v57, %s2962_s2 }
 0xe03   :  { %v1446_v59 = vpop.permute.xlu1 %1445 }
 0xe04   :  { %v1448_v60 = vmul.f32 %v2656_v47, %v1446_v59 }
 0xe06   :  { %v3330_v61 = vmax.f32 %v1244_v23, %v1448_v60  ;;  %1556 = vrot.lane.b32.xlu1 %v1448_v60, %s2962_s2 }
 0xe6a   :  { %v1455_v62 = vpop.permute.xlu0 %1454 }
 0xe6b   :  { %2442 = vmatmul.mubr.msk.f32.vlgmr.msra.gmra.mrb[16].mxu0 %vm166_vm0, %v1455_v62 }
 0xe6c   :  { %2540 = vmatpush3.bf16.msra.mxu0 %v3166_v14  ;;  %2455 = vmatprep.mubr.msk.f32.mxu0 %vm2957_vm1, %v2958_v21 }
 0xe6d   :  { %2544 = vmatprep.subr.bf16.mxu0 %v2956_v13 }
 0xe78   :  { %v1557_v63 = vpop.permute.xlu1 %1556 }
 0xe79   :  { %2449 = vmatmul.mubr.msk.f32.vlgmr.msra.gmra.mrb[20].mxu1 %vm166_vm0, %v1557_v63 }
 0xe7a   :  { %2543 = vmatpush3.bf16.msra.mxu1 %v3173_v19  ;;  %2462 = vmatprep.mubr.msk.f32.mxu1 %vm2957_vm1, %v2958_v21 }
 0xe7b   :  { %2547 = vmatprep.subr.bf16.mxu1 %v2956_v13 }
 0xf3e   :  { %v1524_v1 = vpop.f32.mrb[16].mxu0 }
 0xf3f   :  { %v1528_v2 = vadd.f32 %v1524_v1, %v1452_v0  ;;  %v2443_v3 = vpop.f32.mrb[17].mxu0 }
 0xf41   :  { %2661 = vtanh.f32 %v1528_v2  ;;  %v2247_v10 = vmul.f32 -1.442695, %v1528_v2 }
 0xf4b   :  { %v2662_v4 = vpop.eup %2661 }
 0xf4c   :  { %v1626_v6 = vpop.f32.mrb[20].mxu1  ;;  %1538 = vrot.lane.b32.xlu0 %v2662_v4, %s2959_s8 }
 0xf4d   :  { %v1630_v7 = vadd.f32 %v1626_v6, %v1554_v5  ;;  %v2450_v8 = vpop.f32.mrb[21].mxu1 }
 0xf4f   :  { %2663 = vtanh.f32 %v1630_v7  ;;  %v2249_v12 = vmul.f32 -1.442695, %v1630_v7 }
 0xf50   :  { %2665 = vpow2.f32 %v2247_v10 }
 0xf51   :  { %2667 = vpow2.f32 %v2249_v12 }
 0xf59   :  { %v2664_v9 = vpop.eup %2663 }
 0xf5a   :  { %1640 = vrot.lane.b32.xlu1 %v2664_v9, %s2959_s8  ;;  %v2666_v11 = vpop.eup %2665 }
 0xf5b   :  { %v1532_v15 = vadd.f32 1.0, %v2666_v11  ;;  %v2668_v16 = vpop.eup %2667 }
 0xf5c   :  { %v1634_v18 = vadd.f32 1.0, %v2668_v16  ;;  %v1864_v16 = vld [vmem:[#allocation2 + $0x38] sm:$0xff] }
 0xf5d   :  { %2669 = vrcp.f32 %v1532_v15 }
 0xf5e   :  { %2671 = vrcp.f32 %v1634_v18 }
 0xf67   :  { %v2670_v17 = vpop.eup %2669 }
 0xf68   :  { %v2672_v23 = vpop.eup %2671  ;;  %v1536_v26 = vmul.f32 %v2670_v17, %v1340_v50 }
 0xf69   :  { %v1638_v32 = vmul.f32 %v2672_v23, %v1442_v54 }
 0xfbe   :  { %v1539_v20 = vpop.permute.xlu0 %1538 }
 0xfbf   :  { %v1541_v22 = vmul.f32 %v2670_v17, %v1539_v20 }
 0xfc1   :  { %1543 = vrot.lane.b32.xlu0 %v1541_v22, %s2960_s28 }
 0xfcc   :  { %v1641_v24 = vpop.permute.xlu1 %1640 }
 0xfcd   :  { %v1643_v25 = vmul.f32 %v2672_v23, %v1641_v24 }
 0xfcf   :  { %1645 = vrot.lane.b32.xlu1 %v1643_v25, %s2960_s28 }
0x1033   :  { %v1544_v28 = vpop.permute.xlu0 %1543 }
0x1034   :  { %v1546_v30 = vadd.f32 %v1544_v28, %v1536_v26 }
0x1036   :  { %2673 = vtanh.f32 %v1546_v30 }
0x1040   :  { %v2674_v31 = vpop.eup %2673 }
0x1041   :  { %v1646_v33 = vpop.permute.xlu1 %1645  ;;  %1549 = vrot.lane.b32.xlu0 %v2674_v31, %s2961_s7 }
0x1042   :  { %v1648_v34 = vadd.f32 %v1646_v33, %v1638_v32 }
0x1044   :  { %2675 = vtanh.f32 %v1648_v34 }
0x104e   :  { %v2676_v35 = vpop.eup %2675 }
0x104f   :  { %1651 = vrot.lane.b32.xlu1 %v2676_v35, %s2961_s7 }
0x10b3   :  { %v1550_v36 = vpop.permute.xlu0 %1549 }
0x10b4   :  { %v3349_v37 = vmul.f32 %v2670_v17, %v1550_v36 }
0x10b6   :  { %v1655_v38 = vmax.f32 %v3327_v58, %v3349_v37  ;;  %1660 = vrot.lane.b32.xlu0 %v3349_v37, %s2962_s2 }
0x10c1   :  { %v1652_v39 = vpop.permute.xlu1 %1651 }
0x10c2   :  { %v3355_v40 = vmul.f32 %v2672_v23, %v1652_v39  ;;  %v1965_v23 = vld [vmem:[#allocation3] sm:$0xff] }
0x10c4   :  { %v1656_v41 = vmax.f32 %v3330_v61, %v3355_v40  ;;  %1762 = vrot.lane.b32.xlu1 %v3355_v40, %s2962_s2 }
0x1128   :  { %v1661_v42 = vpop.permute.xlu0 %1660 }
0x1129   :  { %2456 = vmatmul.mubr.msk.f32.vlgmr.msra.gmra.mrb[18].mxu0 %vm166_vm0, %v1661_v42 }
0x112a   :  { %2546 = vmatpush3.bf16.msra.mxu0 %v3166_v14  ;;  %2469 = vmatprep.mubr.msk.f32.mxu0 %vm2957_vm1, %v2958_v21  ;;  %v1760_v14 = vld [vmem:[#allocation3 + $0x8] sm:$0xff] }
0x112b   :  { %2550 = vmatprep.subr.bf16.mxu0 %v2956_v13 }
0x1136   :  { %v1763_v43 = vpop.permute.xlu1 %1762 }
0x1137   :  { %2463 = vmatmul.mubr.msk.f32.vlgmr.msra.gmra.mrb[22].mxu1 %vm166_vm0, %v1763_v43 }
0x1138   :  { %2549 = vmatpush3.bf16.msra.mxu1 %v3173_v19  ;;  %2476 = vmatprep.mubr.msk.f32.mxu1 %vm2957_vm1, %v2958_v21 }
0x11fc   :  { %v1730_v45 = vpop.f32.mrb[18].mxu0 }
0x11fd   :  { %v1734_v46 = vadd.f32 %v1730_v45, %v1658_v44  ;;  %v2457_v47 = vpop.f32.mrb[19].mxu0 }
0x11ff   :  { %2677 = vtanh.f32 %v1734_v46  ;;  %v2251_v19 = vmul.f32 -1.442695, %v1734_v46 }
0x1209   :  { %v2678_v48 = vpop.eup %2677 }
0x120a   :  { %v1832_v27 = vpop.f32.mrb[22].mxu1  ;;  %1744 = vrot.lane.b32.xlu0 %v2678_v48, %s2959_s8 }
0x120b   :  { %v1836_v29 = vadd.f32 %v1832_v27, %v1760_v14  ;;  %v2464_v49 = vpop.f32.mrb[23].mxu1  ;;  %v2103_v14 = vld [vmem:[#allocation16] sm:$0xff]  ;;  %v2104_v27 = vld [vmem:[#allocation16 + $0x8] sm:$0xff] }
0x120c   :  { %v2551_v49 = vpack.c.bf16 %v2104_v27, %v2103_v14 }
0x120d   :  { %2679 = vtanh.f32 %v1836_v29  ;;  %v2253_v52 = vmul.f32 -1.442695, %v1836_v29  ;;  %v2105_v29 = vld [vmem:[#allocation16 + $0x10] sm:$0xff] }
0x120e   :  { %2681 = vpow2.f32 %v2251_v19 }
0x120f   :  { %2683 = vpow2.f32 %v2253_v52 }
0x1217   :  { %v2680_v50 = vpop.eup %2679 }
0x1218   :  { %1846 = vrot.lane.b32.xlu1 %v2680_v50, %s2959_s8  ;;  %v2682_v51 = vpop.eup %2681  ;;  %v2106_v50 = vld [vmem:[#allocation16 + $0x18] sm:$0xff] }
0x1219   :  { %v1738_v53 = vadd.f32 1.0, %v2682_v51  ;;  %v2684_v54 = vpop.eup %2683  ;;  %v2554_v19 = vpack.c.bf16 %v2106_v50, %v2105_v29 }
0x121a   :  { %v1840_v56 = vadd.f32 1.0, %v2684_v54  ;;  %v2107_v54 = vld [vmem:[#allocation16 + $0x20] sm:$0xff] }
0x121b   :  { %2685 = vrcp.f32 %v1738_v53 }
0x121c   :  { %2687 = vrcp.f32 %v1840_v56 }
0x1225   :  { %v2686_v55 = vpop.eup %2685 }
0x1226   :  { %v2688_v59 = vpop.eup %2687  ;;  %v1742_v62 = vmul.f32 %v2686_v55, %v1546_v30 }
0x1227   :  { %v1844_v2 = vmul.f32 %v2688_v59, %v1648_v34 }
0x127c   :  { %v1745_v57 = vpop.permute.xlu0 %1744 }
0x127d   :  { %v1747_v58 = vmul.f32 %v2686_v55, %v1745_v57 }
0x127f   :  { %1749 = vrot.lane.b32.xlu0 %v1747_v58, %s2960_s28 }
0x128a   :  { %v1847_v60 = vpop.permute.xlu1 %1846 }
0x128b   :  { %v1849_v61 = vmul.f32 %v2688_v59, %v1847_v60  ;;  %v2068_v60 = vld [vmem:[#allocation4] sm:$0xff] }
0x128d   :  { %1851 = vrot.lane.b32.xlu1 %v1849_v61, %s2960_s28  ;;  %v2069_v61 = vld [vmem:[#allocation4 + $0x8] sm:$0xff] }
0x12f1   :  { %v1750_v63 = vpop.permute.xlu0 %1749 }
0x12f2   :  { %v1752_v0 = vadd.f32 %v1750_v63, %v1742_v62  ;;  %v2074_v62 = vld [vmem:[#allocation4 + $0x30] sm:$0xff]  ;;  %v2075_v63 = vld [vmem:[#allocation4 + $0x38] sm:$0xff] }
0x12f4   :  { %2689 = vtanh.f32 %v1752_v0 }
0x12fe   :  { %v2690_v1 = vpop.eup %2689 }
0x12ff   :  { %v1852_v3 = vpop.permute.xlu1 %1851  ;;  %1755 = vrot.lane.b32.xlu0 %v2690_v1, %s2961_s7 }
0x1300   :  { %v1854_v4 = vadd.f32 %v1852_v3, %v1844_v2  ;;  %v2710_v2 = vld [vmem:[#allocation4 + $0x18] sm:$0xff] }
0x1301   :  { %v2079_v3 = vsel %vm166_vm0, %v2710_v2, -inf }
0x1302   :  { %2691 = vtanh.f32 %v1854_v4 }
0x130c   :  { %v2692_v5 = vpop.eup %2691 }
0x130d   :  { %1857 = vrot.lane.b32.xlu1 %v2692_v5, %s2961_s7 }
0x1371   :  { %v1756_v6 = vpop.permute.xlu0 %1755 }
0x1372   :  { %v1758_v7 = vmul.f32 %v2686_v55, %v1756_v6  ;;  %v2108_v55 = vld [vmem:[#allocation16 + $0x28] sm:$0xff]  ;;  %v2077_v6 = vsel %vm166_vm0, %v2069_v61, -inf }
0x1373   :  { %v2557_v56 = vpack.c.bf16 %v2108_v55, %v2107_v54 }
0x1374   :  { %v3376_v8 = vmax.f32 %v1655_v38, %v1758_v7  ;;  %1866 = vrot.lane.b32.xlu0 %v1758_v7, %s2962_s2  ;;  %v2712_v7 = vld [vmem:[#allocation4 + $0x28] sm:$0xff] }
0x137f   :  { %v1858_v9 = vpop.permute.xlu1 %1857 }
0x1380   :  { %v1860_v10 = vmul.f32 %v2688_v59, %v1858_v9  ;;  %v2084_v9 = vsel %vm166_vm0, %v2074_v62, -inf }
0x1382   :  { %v3379_v11 = vmax.f32 %v1656_v41, %v1860_v10  ;;  %1967 = vrot.lane.b32.xlu1 %v1860_v10, %s2962_s2  ;;  %v2086_v10 = vsel %vm166_vm0, %v2075_v63, -inf }
0x13e6   :  { %v1867_v12 = vpop.permute.xlu0 %1866 }
0x13e7   :  { %2470 = vmatmul.mubr.msk.f32.vlgmr.msra.gmra.mrb[20].mxu0 %vm166_vm0, %v1867_v12 }
0x13e8   :  { %2491 = vmatprep.mubr.msk.f32.mxu0 %vm2957_vm1, %v2958_v21  ;;  %2552 = vmatpush3.bf16.msra.mxu0 %v2551_v49 }
0x13e9   :  { %2553 = vmatprep.subr.bf16.mxu0 %v2956_v13 }
0x13ec   :  { %2555 = vmatpush3.bf16.msra.mxu0 %v2554_v19 }
0x13ed   :  { %2556 = vmatprep.subr.bf16.mxu0 %v2956_v13  ;;  %v2076_v13 = vsel %vm166_vm0, %v2068_v60, -inf }
0x13f0   :  { %2558 = vmatpush3.bf16.msra.mxu0 %v2557_v56 }
0x13f4   :  { %v1968_v15 = vpop.permute.xlu1 %1967 }
0x13f5   :  { %2477 = vmatmul.mubr.msk.f32.vlgmr.msra.gmra.mrb[24].mxu1 %vm166_vm0, %v1968_v15 }
0x14ba   :  { %v1936_v17 = vpop.f32.mrb[20].mxu0 }
0x14bb   :  { %v1940_v18 = vadd.f32 %v1936_v17, %v1864_v16  ;;  %v2471_v20 = vpop.f32.mrb[21].mxu0  ;;  %v2087_v16 = vmax.f32 %v2079_v3, %v2086_v10 }
0x14bd   :  { %2693 = vtanh.f32 %v1940_v18  ;;  %v2255_v21 = vmul.f32 -1.442695, %v1940_v18 }
0x14c7   :  { %v2694_v22 = vpop.eup %2693 }
0x14c8   :  { %v2037_v24 = vpop.f32.mrb[24].mxu1  ;;  %1950 = vrot.lane.b32.xlu0 %v2694_v22, %s2959_s8 }
0x14c9   :  { %v2041_v25 = vadd.f32 %v2037_v24, %v1965_v23  ;;  %v2478_v26 = vpop.f32.mrb[25].mxu1 }
0x14cb   :  { %2695 = vtanh.f32 %v2041_v25  ;;  %v2257_v31 = vmul.f32 -1.442695, %v2041_v25 }
0x14cc   :  { %2697 = vpow2.f32 %v2255_v21 }
0x14cd   :  { %2699 = vpow2.f32 %v2257_v31 }
0x14d5   :  { %v2696_v28 = vpop.eup %2695 }
0x14d6   :  { %2051 = vrot.lane.b32.xlu1 %v2696_v28, %s2959_s8  ;;  %v2698_v30 = vpop.eup %2697  ;;  %v2258_v28 = vld [vmem:[#allocation18] ss:$0 sm:$0xff] }
0x14d7   :  { %v1944_v32 = vadd.f32 1.0, %v2698_v30  ;;  %v2700_v33 = vpop.eup %2699 }
0x14d8   :  { %v2045_v35 = vadd.f32 1.0, %v2700_v33 }
0x14d9   :  { %2701 = vrcp.f32 %v1944_v32 }
0x14da   :  { %2703 = vrcp.f32 %v2045_v35 }
0x14e3   :  { %v2702_v34 = vpop.eup %2701 }
0x14e4   :  { %v2704_v38 = vpop.eup %2703  ;;  %v1948_v41 = vmul.f32 %v2702_v34, %v1752_v0  ;;  %v2709_v0 = vld [vmem:[#allocation4 + $0x10] sm:$0xff] }
0x14e5   :  { %v2049_v45 = vmul.f32 %v2704_v38, %v1854_v4  ;;  %v2078_v1 = vsel %vm166_vm0, %v2709_v0, -inf  ;;  %v2711_v4 = vld [vmem:[#allocation4 + $0x20] sm:$0xff] }
0x14e6   :  { %v2080_v5 = vsel %vm166_vm0, %v2711_v4, -inf  ;;  %v2085_v15 = vmax.f32 %v2078_v1, %v2084_v9 }
0x14e8   :  { %v2089_v18 = vmax.f32 %v2085_v15, %v2087_v16 }
0x153a   :  { %v1951_v36 = vpop.permute.xlu0 %1950 }
0x153b   :  { %v1953_v37 = vmul.f32 %v2702_v34, %v1951_v36 }
0x153d   :  { %1955 = vrot.lane.b32.xlu0 %v1953_v37, %s2960_s28 }
0x1548   :  { %v2052_v39 = vpop.permute.xlu1 %2051 }
0x1549   :  { %v2054_v40 = vmul.f32 %v2704_v38, %v2052_v39 }
0x154b   :  { %2056 = vrot.lane.b32.xlu1 %v2054_v40, %s2960_s28 }
0x15af   :  { %v1956_v42 = vpop.permute.xlu0 %1955 }
0x15b0   :  { %v1958_v43 = vadd.f32 %v1956_v42, %v1948_v41 }
0x15b2   :  { %2705 = vtanh.f32 %v1958_v43 }
0x15bc   :  { %v2706_v44 = vpop.eup %2705 }
0x15bd   :  { %v2057_v46 = vpop.permute.xlu1 %2056  ;;  %1961 = vrot.lane.b32.xlu0 %v2706_v44, %s2961_s7 }
0x15be   :  { %v2059_v47 = vadd.f32 %v2057_v46, %v2049_v45 }
0x15c0   :  { %2707 = vtanh.f32 %v2059_v47 }
0x15ca   :  { %v2708_v48 = vpop.eup %2707 }
0x15cb   :  { %2062 = vrot.lane.b32.xlu1 %v2708_v48, %s2961_s7 }
0x162f   :  { %v1962_v51 = vpop.permute.xlu0 %1961 }
0x1630   :  { %v1964_v52 = vmul.f32 %v2702_v34, %v1962_v51 }
0x1632   :  { %v2066_v53 = vmax.f32 %v3376_v8, %v1964_v52  ;;  %v2082_v8 = vsel %vm166_vm0, %v2712_v7, -inf }
0x1633   :  { %v2083_v12 = vmax.f32 %v2077_v6, %v2082_v8 }
0x1634   :  { %2092 = vrot.lane.b32.xlu0 %v2066_v53, %s2959_s8 }
0x163d   :  { %v2063_v57 = vpop.permute.xlu1 %2062 }
0x163e   :  { %v2065_v58 = vmul.f32 %v2704_v38, %v2063_v57 }
0x1640   :  { %v2067_v59 = vmax.f32 %v3379_v11, %v2065_v58  ;;  %v2081_v11 = vmax.f32 %v2076_v13, %v2080_v5 }
0x1642   :  { %2096 = vrot.lane.b32.xlu1 %v2067_v59, %s2963_s23  ;;  %v2088_v17 = vmax.f32 %v2081_v11, %v2083_v12 }
0x1644   :  { %v2090_v20 = vmax.f32 %v2088_v17, %v2089_v18 }
0x16a6   :  { %v2093_v22 = vpop.permute.xlu0 %2092 }
0x16a7   :  { %v2099_v23 = vsel %vm166_vm0, %v2090_v20, %v2093_v22 }
0x16b4   :  { %v2097_v24 = vpop.permute.xlu1 %2096 }
0x16b5   :  { %v2101_v25 = vsel %vm2100_vm3, %v2099_v23, %v2097_v24 }
0x16b6   :  { %v2102_v26 = vmax.f32 %v2101_v25, 0.0 }
0x16b8   :  { %2492 = vmatmul.mubr.msk.f32.vlgmr.msra.gmra.mrb[22].mxu0 %vm2116_vm4, %v2102_v26 }
0x178b   :  { %v2186_v21 = vpop.f32.mrb[22].mxu0 }
0x178c   :  { %v2187_v30 = vadd.f32 %v2258_v28, %v2186_v21  ;;  %v2493_v31 = vpop.f32.mrb[23].mxu0 }
0x178e   :  { %2190 = vst [vmem:[#allocation19] sm:$0xff] %v2187_v30 }
0x178f   :  { %2922 = shalt.err (!%p2919_p6)
}
0x1790   :  { %s2923_s1 = scalar_lea.hbm %s3427_s9, 128 }
0x1791   :  { %p2924_p7 = scmp.ne.s32.totalorder %s3427_s9, %s2923_s1  ;;  %p2927_p8 = scmp.lt.u32.totalorder %s2923_s1, %s3427_s9 }
0x1793   :  { %p2929_p9 = pnand %p2927_p8, %p2924_p7 }
0x1795   :  { %2932 = shalt.err (!%p2929_p9)
}
0x1796   :  { %2200 = dma.vmem_to_hbm [thread:$0]  %s2198_s29, 128, %s3427_s9, [#allocation6]  }
0x1797   :  { %2943 = dma.done.wait [#allocation6], 128  }
0x1798   :  { %2944 = vsyncadd [#allocation6], 4294967168 }
0x1799   :  { %2204 = vsyncpa [#allocation5], 1 }
0x179a   :  { %2205 = vsyncpa [#allocation8], 1 }
0x179b   :  { %2206 = vsyncpa [#allocation11], 1 }
0x179c   :  { %2207 = vsyncpa [#allocation14], 1 }
0x179d   :  { %2208 = vsyncpa [#allocation17], 1 }
0x179e   :  { %2209 = vsyncpa [#allocation6], 1 }

</bundles_post_ra>
